<compile_context>
chip_gen: v5e
topology: v5e:2x2
jax: 0.10.0
libtpu: 0.0.40
codegen_flags: <defaults>
</compile_context>

<pallas_src>
import jax
import jax.numpy as jnp
from jax.experimental import pallas as pl
from jax.experimental.pallas import tpu as pltpu


_RESIDENT_D_MAX = 4096   # keep W1 fully resident (<= 4 MiB bf16) below this
_DEFAULT_TK = 2048       # K tile for the streamed path (safe for v5e's 16 MiB
                         # scoped VMEM; raise to 4096-8192 on v6e/v7x for very
                         # large D, together with vmem_limit_bytes if needed)


def _round_up(a, b):
    return pl.cdiv(a, b) * b


def _epilogue(h, b1_ref, w2_ref, b2_ref, o_ref):
    """bias + LeakyReLU(0.2) + N=1 second layer (VPU mul + row reduce) + sigmoid."""
    h = h + b1_ref[...]
    h = jnp.where(h > 0, h, 0.2 * h)                               # LeakyReLU (VPU)
    logits = jnp.sum(h * w2_ref[...], axis=-1, keepdims=True) + b2_ref[0]
    o_ref[...] = pl.reciprocal(1.0 + jnp.exp(-logits), approx=False).astype(o_ref.dtype)


def _disc_kernel_resident(x_ref, w1_ref, b1_ref, w2_ref, b2_ref, o_ref):
    # x_ref: (TB, D) f32   w1_ref: (D, H) bf16 (resident)
    # b1_ref/w2_ref: (1, H) f32 (resident)   b2_ref: (1,) f32 in SMEM
    h = jnp.dot(x_ref[...].astype(jnp.bfloat16), w1_ref[...],
                preferred_element_type=jnp.float32)
    _epilogue(h, b1_ref, w2_ref, b2_ref, o_ref)


def _disc_kernel_streamed(x_ref, w1_ref, b1_ref, w2_ref, b2_ref, o_ref, acc_ref):
    # x_ref: (TB, tk) f32   w1_ref: (tk, H) bf16 (streamed over k)
    # acc_ref: (TB, H) f32 VMEM scratch accumulator
    k = pl.program_id(1)
    part = jnp.dot(x_ref[...].astype(jnp.bfloat16), w1_ref[...],
                   preferred_element_type=jnp.float32)

    @pl.when(k == 0)
    def _():
        acc_ref[...] = part            # write-on-first: no separate zero pass

    @pl.when(k > 0)
    def _():
        acc_ref[...] += part

    @pl.when(k == pl.num_programs(1) - 1)
    def _():
        _epilogue(acc_ref[...], b1_ref, w2_ref, b2_ref, o_ref)


def prepare_discriminator_params(w1, b1, w2, b2, *, tk=None,
                                 resident_d_max=_RESIDENT_D_MAX):
    """One-time parameter prep (hoisted out of the forward pass).

    Returns (params, cfg) where `params` holds the pre-padded / pre-cast
    device arrays and `cfg` holds static layout metadata.
    """
    D, H = w1.shape
    resident = D <= resident_d_max
    if resident:
        tk_eff = D
        d_pad = D
        w1_p = w1.astype(jnp.bfloat16)                    # no pad needed
    else:
        tk_eff = int(tk) if tk is not None else _DEFAULT_TK
        d_pad = int(_round_up(D, tk_eff))
        w1_p = jnp.pad(w1, ((0, d_pad - D), (0, 0))).astype(jnp.bfloat16)

    params = dict(
        w1=w1_p,
        b1=b1.reshape(1, H).astype(jnp.float32),
        w2=w2.reshape(1, H).astype(jnp.float32),
        b2=b2.reshape(1).astype(jnp.float32),
    )
    cfg = dict(D=D, D_pad=d_pad, H=H, tk=tk_eff, resident=resident)
    return params, cfg


def _pick_batch_tile(B, block_width):
    """Choose the batch tile TB and padded batch B_pad.

    * >= 2 blocks whenever B >= 32 so both v7x TensorCores get work.
    * TB capped so the double-buffered f32 x block stays under ~6 MiB, keeping
      total VMEM (x + double-buffered W1 + scratch) within v5e's 16 MiB scoped
      default (and well within v6e/v7x defaults).
    """
    b16 = _round_up(B, 16)
    if b16 <= 16:
        tb = b16                                  # single block (accept 1 core)
    elif b16 <= 512:
        tb = _round_up(pl.cdiv(b16, 2), 16)       # exactly 2 blocks
    else:
        tb = 256
    cap = max(16, (((6 << 20) // (8 * block_width)) // 16) * 16)
    tb = min(tb, cap)
    return tb, _round_up(B, tb)


def discriminator_forward(x_nchw, params, cfg):
    """x_nchw: (B, C, H, W) float32. Returns (B, 1) float32 in [0, 1]."""
    B = x_nchw.shape[0]
    x_flat = x_nchw.reshape(B, -1)                # row-major == torch .view(B, -1)
    D, D_pad, H, tk = cfg["D"], cfg["D_pad"], cfg["H"], cfg["tk"]
    assert x_flat.shape[1] == D, "input dim does not match prepared params"

    block_width = D_pad if cfg["resident"] else tk
    TB, B_pad = _pick_batch_tile(B, block_width)
    nb = B_pad // TB

    if cfg["resident"]:
        # --- Small-D fast path: W1 fully resident, single grid step per batch
        #     block, no accumulator scratch, no D pad / dtype cast of x.
        x_in = x_flat if B_pad == B else jnp.pad(x_flat, ((0, B_pad - B), (0, 0)))
        kernel = _disc_kernel_resident
        grid = (nb,)
        in_specs = [
            pl.BlockSpec((TB, D_pad), lambda b: (b, 0)),           # x tile (f32)
            pl.BlockSpec((D_pad, H), lambda b: (0, 0)),            # W1 (resident bf16)
            pl.BlockSpec((1, H), lambda b: (0, 0)),                # b1 (resident)
            pl.BlockSpec((1, H), lambda b: (0, 0)),                # w2 row (resident)
            pl.BlockSpec(memory_space=pltpu.MemorySpace.SMEM),     # b2 scalar
        ]
        out_specs = pl.BlockSpec((TB, 1), lambda b: (b, 0))
        scratch = []
        dims = ("parallel",)
    else:
        # --- Large-D path: stream W1 over a K axis with f32 VMEM accumulation.
        pad_d = D_pad - D
        if B_pad == B and pad_d == 0:
            x_in = x_flat
        else:
            x_in = jnp.pad(x_flat, ((0, B_pad - B), (0, pad_d)))
        nk = D_pad // tk
        kernel = _disc_kernel_streamed
        grid = (nb, nk)
        in_specs = [
            pl.BlockSpec((TB, tk), lambda b, k: (b, k)),           # x tile (f32)
            pl.BlockSpec((tk, H), lambda b, k: (k, 0)),            # W1 tile (streamed)
            pl.BlockSpec((1, H), lambda b, k: (0, 0)),             # b1 (resident)
            pl.BlockSpec((1, H), lambda b, k: (0, 0)),             # w2 row (resident)
            pl.BlockSpec(memory_space=pltpu.MemorySpace.SMEM),     # b2 scalar
        ]
        out_specs = pl.BlockSpec((TB, 1), lambda b, k: (b, 0))
        scratch = [pltpu.VMEM((TB, H), jnp.float32)]
        dims = ("parallel", "arbitrary")

    out = pl.pallas_call(
        kernel,
        out_shape=jax.ShapeDtypeStruct((B_pad, 1), jnp.float32),
        grid=grid,
        in_specs=in_specs,
        out_specs=out_specs,
        scratch_shapes=scratch,
        compiler_params=pltpu.CompilerParams(dimension_semantics=dims),
    )(x_in, params["w1"], params["b1"], params["w2"], params["b2"])

    return out[:B]


def init_discriminator_params(key, input_dim, hidden=512):
    """Deterministic init matching nn.Linear's default U(-1/sqrt(fan_in), ...)."""
    k1, k2, k3, k4 = jax.random.split(key, 4)
    bound1 = 1.0 / jnp.sqrt(jnp.float32(input_dim))
    bound2 = 1.0 / jnp.sqrt(jnp.float32(hidden))
    w1 = jax.random.uniform(k1, (input_dim, hidden), jnp.float32, -bound1, bound1)
    b1 = jax.random.uniform(k2, (hidden,), jnp.float32, -bound1, bound1)
    w2 = jax.random.uniform(k3, (hidden, 1), jnp.float32, -bound2, bound2)
    b2 = jax.random.uniform(k4, (1,), jnp.float32, -bound2, bound2)
    return w1, b1, w2, b2


if __name__ == "__main__":
    key = jax.random.PRNGKey(0)
    k_x, k_p = jax.random.split(key)

    # Small input consistent with the module: input_shape = (C, H, W) = (4, 16, 16)
    B, C, Himg, Wimg = 2, 4, 16, 16
    x = jax.random.normal(k_x, (B, C, Himg, Wimg), jnp.float32)

    input_dim = C * Himg * Wimg  # 1024
    w1, b1, w2, b2 = init_discriminator_params(k_p, input_dim, hidden=512)

    # Reference in plain JAX with the same bf16 cast of x / W1 (f32 epilogue).
    x_flat = x.reshape(B, -1)
    xb = x_flat.astype(jnp.bfloat16).astype(jnp.float32)
    wb = w1.astype(jnp.bfloat16).astype(jnp.float32)
    h_ref = jnp.dot(xb, wb, precision=jax.lax.Precision.HIGHEST) + b1
    h_ref = jnp.where(h_ref > 0, h_ref, 0.2 * h_ref)
    logits_ref = jnp.dot(h_ref, w2, precision=jax.lax.Precision.HIGHEST) + b2
    ref = jax.nn.sigmoid(logits_ref)

    # Path 1: small-D fast path (W1 resident, single grid step per batch block).
    params, cfg = prepare_discriminator_params(w1, b1, w2, b2)
    out = jax.block_until_ready(discriminator_forward(x, params, cfg))
    assert out.shape == (B, 1)
    assert jnp.allclose(out, ref, atol=2e-3, rtol=2e-3), (out, ref)

    # Path 2: exercise the K-streamed accumulator kernel on the same small
    # problem (forced via resident_d_max=0, tk=512 -> 2 K tiles).
    params_s, cfg_s = prepare_discriminator_params(w1, b1, w2, b2, tk=512,
                                                   resident_d_max=0)
    out_s = jax.block_until_ready(discriminator_forward(x, params_s, cfg_s))
    assert out_s.shape == (B, 1)
    assert jnp.allclose(out_s, ref, atol=2e-3, rtol=2e-3), (out_s, ref)

    print("KERNEL_OK")
</pallas_src>

<mosaic_0001>
module attributes {stable_mosaic.version = 11 : i64} {
  func.func @_disc_kernel_resident(%arg0: i32, %arg1: memref<16x1024xf32, #tpu.memory_space<vmem>>, %arg2: memref<1024x512xbf16, #tpu.memory_space<vmem>>, %arg3: memref<1x512xf32, #tpu.memory_space<vmem>>, %arg4: memref<1x512xf32, #tpu.memory_space<vmem>>, %arg5: memref<1xf32, #tpu.memory_space<smem>>, %arg6: memref<16x1xf32, #tpu.memory_space<vmem>>) attributes {dimension_semantics = [#tpu.dimension_semantics<parallel>], iteration_bounds = array<i64: 1>, scalar_prefetch = 0 : i64, scratch_operands = 0 : i64, tpu.core_type = #tpu.core_type<tc>, window_params = [{transform_indices = @transform_0, window_bounds = array<i64: 16, 1024>}, {pipeline_mode = #tpu.pipeline_mode<synchronous>, transform_indices = @transform_1, window_bounds = array<i64: 1024, 512>}, {pipeline_mode = #tpu.pipeline_mode<synchronous>, transform_indices = @transform_2, window_bounds = array<i64: 1, 512>}, {pipeline_mode = #tpu.pipeline_mode<synchronous>, transform_indices = @transform_3, window_bounds = array<i64: 1, 512>}, {transform_indices = @transform_4, window_bounds = array<i64: 1>}, {transform_indices = @transform_5, window_bounds = array<i64: 16, 1>}]} {
    %c0 = arith.constant 0 : index
    %c0_0 = arith.constant 0 : index
    %0 = vector.load %arg1[%c0, %c0_0] : memref<16x1024xf32, #tpu.memory_space<vmem>>, vector<16x1024xf32>
    %1 = arith.truncf %0 : vector<16x1024xf32> to vector<16x1024xbf16>
    %c0_1 = arith.constant 0 : index
    %c0_2 = arith.constant 0 : index
    %2 = vector.load %arg2[%c0_1, %c0_2] : memref<1024x512xbf16, #tpu.memory_space<vmem>>, vector<1024x512xbf16>
    %cst = arith.constant dense<0.000000e+00> : vector<16x512xf32>
    %3 = tpu.matmul %1, %2, %cst {dimension_numbers = #tpu.dot_dimension_numbers<[1], [0], [0], [1], [0, 0, 1, 1], [], []>} : vector<16x1024xbf16>, vector<1024x512xbf16>, vector<16x512xf32> -> vector<16x512xf32>
    %c0_3 = arith.constant 0 : index
    %c0_4 = arith.constant 0 : index
    %4 = vector.load %arg3[%c0_3, %c0_4] : memref<1x512xf32, #tpu.memory_space<vmem>>, vector<1x512xf32>
    %5 = vector.broadcast %4 : vector<1x512xf32> to vector<16x512xf32>
    %6 = arith.addf %3, %5 : vector<16x512xf32>
    %cst_5 = arith.constant 0.000000e+00 : f32
    %7 = vector.broadcast %cst_5 : f32 to vector<16x512xf32>
    %8 = arith.cmpf ogt, %6, %7 : vector<16x512xf32>
    %cst_6 = arith.constant 2.000000e-01 : f32
    %9 = vector.broadcast %cst_6 : f32 to vector<16x512xf32>
    %10 = arith.mulf %9, %6 : vector<16x512xf32>
    %11 = arith.select %8, %6, %10 : vector<16x512xi1>, vector<16x512xf32>
    %c0_7 = arith.constant 0 : index
    %c0_8 = arith.constant 0 : index
    %12 = vector.load %arg4[%c0_7, %c0_8] : memref<1x512xf32, #tpu.memory_space<vmem>>, vector<1x512xf32>
    %13 = vector.broadcast %12 : vector<1x512xf32> to vector<16x512xf32>
    %14 = arith.mulf %11, %13 : vector<16x512xf32>
    %cst_9 = arith.constant dense<0.000000e+00> : vector<16xf32>
    %15 = vector.multi_reduction <add>, %14, %cst_9 [1] : vector<16x512xf32> to vector<16xf32>
    %16 = vector.shape_cast %15 : vector<16xf32> to vector<16x1xf32>
    %c0_10 = arith.constant 0 : index
    %17 = memref.load %arg5[%c0_10] : memref<1xf32, #tpu.memory_space<smem>>
    %18 = vector.broadcast %17 : f32 to vector<16x1xf32>
    %19 = arith.addf %16, %18 : vector<16x1xf32>
    %cst_11 = arith.constant 0.000000e+00 : f32
    %20 = vector.broadcast %cst_11 : f32 to vector<16x1xf32>
    %21 = arith.subf %20, %19 : vector<16x1xf32>
    %22 = math.exp %21 : vector<16x1xf32>
    %cst_12 = arith.constant 1.000000e+00 : f32
    %23 = vector.broadcast %cst_12 : f32 to vector<16x1xf32>
    %24 = arith.addf %23, %22 : vector<16x1xf32>
    %25 = tpu.reciprocal %24 : vector<16x1xf32> -> vector<16x1xf32>
    %c0_13 = arith.constant 0 : index
    %c0_14 = arith.constant 0 : index
    %26 = vector.load %arg6[%c0_13, %c0_14] : memref<16x1xf32, #tpu.memory_space<vmem>>, vector<16x1xf32>
    tpu.vector_store %arg6[%c0_13, %c0_14], %25 {strides = array<i32>} : memref<16x1xf32, #tpu.memory_space<vmem>>, vector<16x1xf32>,
    return
  }
  func.func @transform_0(%arg0: i32) -> (i32, i32) {
    %c0_i32 = arith.constant 0 : i32
    %c0_i32_0 = arith.constant 0 : i32
    return %arg0, %c0_i32 : i32, i32
  }
  func.func @transform_1(%arg0: i32) -> (i32, i32) {
    %c0_i32 = arith.constant 0 : i32
    %c0_i32_0 = arith.constant 0 : i32
    %c0_i32_1 = arith.constant 0 : i32
    return %c0_i32, %c0_i32_0 : i32, i32
  }
  func.func @transform_2(%arg0: i32) -> (i32, i32) {
    %c0_i32 = arith.constant 0 : i32
    %c0_i32_0 = arith.constant 0 : i32
    %c0_i32_1 = arith.constant 0 : i32
    return %c0_i32, %c0_i32_0 : i32, i32
  }
  func.func @transform_3(%arg0: i32) -> (i32, i32) {
    %c0_i32 = arith.constant 0 : i32
    %c0_i32_0 = arith.constant 0 : i32
    %c0_i32_1 = arith.constant 0 : i32
    return %c0_i32, %c0_i32_0 : i32, i32
  }
  func.func @transform_4(%arg0: i32) -> i32 {
    %c0_i32 = arith.constant 0 : i32
    %c0_i32_0 = arith.constant 0 : i32
    return %c0_i32 : i32
  }
  func.func @transform_5(%arg0: i32) -> (i32, i32) {
    %c0_i32 = arith.constant 0 : i32
    %c0_i32_0 = arith.constant 0 : i32
    return %arg0, %c0_i32 : i32, i32
  }
}

</mosaic_0001>

<bundles_post_ra>
// kernel: tpu_custom_call.1
= control target key start
LH: loop header
LB: loop body
LE: loop exit
PB: predicated region body
PF: predicated region fallthrough
CT: control target
= control target key end

     0   :  { %11 = vsyncpa [#allocation4], 0  ;;  %s3698_s0 = inlined_call_operand.hbm [shape: f32[16,1024], index: 0, kind: input, shape index: {}]   ;;  %s3699_s1 = inlined_call_operand.hbm [shape: bf16[1024,512], index: 1, kind: input, shape index: {}]   ;;  %s3700_s2 = inlined_call_operand.hbm [shape: f32[1,512], index: 2, kind: input, shape index: {}]   ;;  %s3701_s3 = inlined_call_operand.vmem [shape: f32[1,512], index: 3, kind: input, shape index: {}]   ;;  %s3702_s4 = inlined_call_operand.<no memory space> [shape: f32[1], index: 4, kind: input, shape index: {}]   ;;  %s3703_s5 = inlined_call_operand.vmem [shape: f32[16,1], index: 5, kind: output, shape index: {}]  }
   0x1   :  { %12 = vsyncpa [#allocation6], 0  ;;  %s30_s20 = sshll.u32 %s3699_s1, 4  ;;  %s3556_s21 = smov [#allocation5]   ;;  %s31_s20 = int_to_ptr.hbm [resolvable:$true] %s30_s20 }
   0x2   :  { %s32_s22 = sshll.u32 %s3556_s21, 4  ;;  %s17_s25 = sshll.u32 %s3698_s0, 4  ;;  %s33_s22 = int_to_ptr.vmem [resolvable:$true] %s32_s22  ;;  %s18_s25 = int_to_ptr.hbm [resolvable:$true] %s17_s25 }
   0x3   :  { %s3557_s26 = smov 256   ;;  %s3558_s27 = smov 16  }
   0x4   :  { %38 = dma.hbm_to_vmem [thread:$0]  %s31_s20, 32768, %s33_s22, [#allocation6], %s3557_s26, %s3557_s26, %s3558_s27  }
   0x5   :  { %s3559_s28 = smov [#allocation3]   ;;  %s3560_s30 = smov 1024  }
   0x6   :  { %s19_s29 = sshll.u32 %s3559_s28, 4  ;;  %s3561_s6 = smov 64   ;;  %s20_s29 = int_to_ptr.vmem [resolvable:$true] %s19_s29 }
   0x7   :  { %25 = dma.hbm_to_vmem [thread:$0]  %s18_s25, 2048, %s20_s29, [#allocation4], %s3560_s30, %s3560_s30, %s3561_s6  }
   0x8   :  { %s44_s8 = sshll.u32 %s3700_s2, 4  ;;  %s3562_s9 = smov [#allocation7]   ;;  %s45_s8 = int_to_ptr.hbm [resolvable:$true] %s44_s8 }
   0x9   :  { %s46_s10 = sshll.u32 %s3562_s9, 4  ;;  %s47_s10 = int_to_ptr.vmem [resolvable:$true] %s46_s10 }
   0xa   :  { %49 = dma.hbm_to_vmem [thread:$0]  %s45_s8, 64, %s47_s10, [#allocation6]  }
   0xb   :  { %3552 = dma.done.wait [#allocation4], 2048  }
   0xc   :  { %3553 = vsyncadd [#allocation4], 4294965248 }
   0xd   :  { %3554 = dma.done.wait [#allocation6], 32832  }
   0xe   :  { %3555 = vsyncadd [#allocation6], 4294934464  ;;  %v2299_v0 = vld [vmem:[#allocation5 + $0xe0] sm:$0xf]  ;;  %v3239_v1 = vld [vmem:[#allocation5 + $0xec] sm:$0xf0] }
   0xf   :  { %v2427_v2 = vld [vmem:[#allocation5 + $0x1e0] sm:$0xf]  ;;  %v2300_v3 = vor.u32 %v3239_v1, %v2299_v0  ;;  %v3271_v4 = vld [vmem:[#allocation5 + $0x1ec] sm:$0xf0]  ;;  %vm2176_vm10 = vcmask 7168  }
  0x10   :  { %v2555_v5 = vld [vmem:[#allocation5 + $0x2e0] sm:$0xf]  ;;  %v3303_v6 = vld [vmem:[#allocation5 + $0x2ec] sm:$0xf0]  ;;  %v2428_v7 = vor.u32 %v3271_v4, %v2427_v2 }
  0x11   :  { %v2556_v8 = vor.u32 %v3303_v6, %v2555_v5  ;;  %v2683_v9 = vld [vmem:[#allocation5 + $0x3e0] sm:$0xf]  ;;  %v3335_v10 = vld [vmem:[#allocation5 + $0x3ec] sm:$0xf0]  ;;  %1636 = vmatpush.bf16.msra.mxu0 %v2300_v3 }
  0x12   :  { %v2283_v11 = vld [vmem:[#allocation5 + $0xc0] sm:$0xf]  ;;  %v2684_v12 = vor.u32 %v3335_v10, %v2683_v9  ;;  %v3235_v13 = vld [vmem:[#allocation5 + $0xcc] sm:$0xf0]  ;;  %1650 = vmatpush.bf16.msra.mxu1 %v2428_v7 }
  0x13   :  { %v2411_v14 = vld [vmem:[#allocation5 + $0x1c0] sm:$0xf]  ;;  %v3267_v15 = vld [vmem:[#allocation5 + $0x1cc] sm:$0xf0]  ;;  %1664 = vmatpush.bf16.msra.mxu2 %v2556_v8  ;;  %v2284_v16 = vor.u32 %v3235_v13, %v2283_v11 }
  0x14   :  { %v2412_v17 = vor.u32 %v3267_v15, %v2411_v14  ;;  %v2539_v18 = vld [vmem:[#allocation5 + $0x2c0] sm:$0xf]  ;;  %v3299_v19 = vld [vmem:[#allocation5 + $0x2cc] sm:$0xf0]  ;;  %1678 = vmatpush.bf16.msra.mxu3 %v2684_v12 }
  0x15   :  { %v2667_v20 = vld [vmem:[#allocation5 + $0x3c0] sm:$0xf]  ;;  %v2540_v21 = vor.u32 %v3299_v19, %v2539_v18  ;;  %v3331_v22 = vld [vmem:[#allocation5 + $0x3cc] sm:$0xf0]  ;;  %1637 = vmatpush.bf16.msra.mxu0 %v2284_v16 }
  0x16   :  { %v2267_v23 = vld [vmem:[#allocation5 + $0xa0] sm:$0xf]  ;;  %v3231_v24 = vld [vmem:[#allocation5 + $0xac] sm:$0xf0]  ;;  %v2668_v25 = vor.u32 %v3331_v22, %v2667_v20  ;;  %1651 = vmatpush.bf16.msra.mxu1 %v2412_v17 }
  0x17   :  { %v2395_v26 = vld [vmem:[#allocation5 + $0x1a0] sm:$0xf]  ;;  %v3263_v27 = vld [vmem:[#allocation5 + $0x1ac] sm:$0xf0]  ;;  %v2268_v29 = vor.u32 %v3231_v24, %v2267_v23  ;;  %1665 = vmatpush.bf16.msra.mxu2 %v2540_v21 }
  0x18   :  { %v2523_v28 = vld [vmem:[#allocation5 + $0x2a0] sm:$0xf]  ;;  %v3295_v30 = vld [vmem:[#allocation5 + $0x2ac] sm:$0xf0]  ;;  %v2396_v33 = vor.u32 %v3263_v27, %v2395_v26  ;;  %1679 = vmatpush.bf16.msra.mxu3 %v2668_v25 }
  0x19   :  { %v2651_v31 = vld [vmem:[#allocation5 + $0x3a0] sm:$0xf]  ;;  %v3327_v32 = vld [vmem:[#allocation5 + $0x3ac] sm:$0xf0]  ;;  %v2524_v34 = vor.u32 %v3295_v30, %v2523_v28  ;;  %1638 = vmatpush.bf16.msra.mxu0 %v2268_v29 }
  0x1a   :  { %v2251_v35 = vld [vmem:[#allocation5 + $0x80] sm:$0xf]  ;;  %v3227_v36 = vld [vmem:[#allocation5 + $0x8c] sm:$0xf0]  ;;  %v2652_v38 = vor.u32 %v3327_v32, %v2651_v31  ;;  %1652 = vmatpush.bf16.msra.mxu1 %v2396_v33 }
  0x1b   :  { %v2379_v37 = vld [vmem:[#allocation5 + $0x180] sm:$0xf]  ;;  %v3259_v39 = vld [vmem:[#allocation5 + $0x18c] sm:$0xf0]  ;;  %v2252_v44 = vor.u32 %v3227_v36, %v2251_v35  ;;  %1666 = vmatpush.bf16.msra.mxu2 %v2524_v34 }
  0x1c   :  { %v2507_v40 = vld [vmem:[#allocation5 + $0x280] sm:$0xf]  ;;  %v3291_v41 = vld [vmem:[#allocation5 + $0x28c] sm:$0xf0]  ;;  %v2380_v45 = vor.u32 %v3259_v39, %v2379_v37  ;;  %1680 = vmatpush.bf16.msra.mxu3 %v2652_v38 }
  0x1d   :  { %v2635_v42 = vld [vmem:[#allocation5 + $0x380] sm:$0xf]  ;;  %v3323_v43 = vld [vmem:[#allocation5 + $0x38c] sm:$0xf0]  ;;  %v2508_v46 = vor.u32 %v3291_v41, %v2507_v40  ;;  %1639 = vmatpush.bf16.msra.mxu0 %v2252_v44 }
  0x1e   :  { %v2235_v47 = vld [vmem:[#allocation5 + $0x60] sm:$0xf]  ;;  %v3223_v48 = vld [vmem:[#allocation5 + $0x6c] sm:$0xf0]  ;;  %v2636_v50 = vor.u32 %v3323_v43, %v2635_v42  ;;  %1653 = vmatpush.bf16.msra.mxu1 %v2380_v45 }
  0x1f   :  { %v2363_v49 = vld [vmem:[#allocation5 + $0x160] sm:$0xf]  ;;  %v3255_v51 = vld [vmem:[#allocation5 + $0x16c] sm:$0xf0]  ;;  %v2236_v56 = vor.u32 %v3223_v48, %v2235_v47  ;;  %1667 = vmatpush.bf16.msra.mxu2 %v2508_v46 }
  0x20   :  { %v2491_v52 = vld [vmem:[#allocation5 + $0x260] sm:$0xf]  ;;  %v3287_v53 = vld [vmem:[#allocation5 + $0x26c] sm:$0xf0]  ;;  %v2364_v57 = vor.u32 %v3255_v51, %v2363_v49  ;;  %1681 = vmatpush.bf16.msra.mxu3 %v2636_v50 }
  0x21   :  { %v2619_v54 = vld [vmem:[#allocation5 + $0x360] sm:$0xf]  ;;  %v3319_v55 = vld [vmem:[#allocation5 + $0x36c] sm:$0xf0]  ;;  %v2492_v58 = vor.u32 %v3287_v53, %v2491_v52  ;;  %1640 = vmatpush.bf16.msra.mxu0 %v2236_v56 }
  0x22   :  { %v2219_v59 = vld [vmem:[#allocation5 + $0x40] sm:$0xf]  ;;  %v3219_v60 = vld [vmem:[#allocation5 + $0x4c] sm:$0xf0]  ;;  %v2620_v62 = vor.u32 %v3319_v55, %v2619_v54  ;;  %1654 = vmatpush.bf16.msra.mxu1 %v2364_v57 }
  0x23   :  { %v2347_v61 = vld [vmem:[#allocation5 + $0x140] sm:$0xf]  ;;  %v3251_v63 = vld [vmem:[#allocation5 + $0x14c] sm:$0xf0]  ;;  %v2220_v4 = vor.u32 %v3219_v60, %v2219_v59  ;;  %1668 = vmatpush.bf16.msra.mxu2 %v2492_v58 }
  0x24   :  { %v2475_v0 = vld [vmem:[#allocation5 + $0x240] sm:$0xf]  ;;  %v3283_v1 = vld [vmem:[#allocation5 + $0x24c] sm:$0xf0]  ;;  %v2348_v5 = vor.u32 %v3251_v63, %v2347_v61  ;;  %1682 = vmatpush.bf16.msra.mxu3 %v2620_v62 }
  0x25   :  { %v2603_v2 = vld [vmem:[#allocation5 + $0x340] sm:$0xf]  ;;  %v3315_v3 = vld [vmem:[#allocation5 + $0x34c] sm:$0xf0]  ;;  %v2476_v6 = vor.u32 %v3283_v1, %v2475_v0  ;;  %1641 = vmatpush.bf16.msra.mxu0 %v2220_v4 }
  0x26   :  { %v2203_v7 = vld [vmem:[#allocation5 + $0x20] sm:$0xf]  ;;  %v3215_v8 = vld [vmem:[#allocation5 + $0x2c] sm:$0xf0]  ;;  %v2604_v10 = vor.u32 %v3315_v3, %v2603_v2  ;;  %1655 = vmatpush.bf16.msra.mxu1 %v2348_v5 }
  0x27   :  { %v2331_v9 = vld [vmem:[#allocation5 + $0x120] sm:$0xf]  ;;  %v3247_v11 = vld [vmem:[#allocation5 + $0x12c] sm:$0xf0]  ;;  %v2204_v16 = vor.u32 %v3215_v8, %v2203_v7  ;;  %1669 = vmatpush.bf16.msra.mxu2 %v2476_v6  ;;  %v67_v6 = vld [vmem:[#allocation3 + $0x8] sm:$0xff] }
  0x28   :  { %v2459_v12 = vld [vmem:[#allocation5 + $0x220] sm:$0xf]  ;;  %v3279_v13 = vld [vmem:[#allocation5 + $0x22c] sm:$0xf0]  ;;  %v2332_v19 = vor.u32 %v3247_v11, %v2331_v9  ;;  %1683 = vmatpush.bf16.msra.mxu3 %v2604_v10  ;;  %v75_v7 = vld [vmem:[#allocation3 + $0x48] sm:$0xff] }
  0x29   :  { %v2587_v14 = vld [vmem:[#allocation5 + $0x320] sm:$0xf]  ;;  %v3311_v15 = vld [vmem:[#allocation5 + $0x32c] sm:$0xf0]  ;;  %v2460_v20 = vor.u32 %v3279_v13, %v2459_v12  ;;  %1642 = vmatpush.bf16.msra.mxu0 %v2204_v16  ;;  %v69_v8 = vld [vmem:[#allocation3 + $0x18] sm:$0xff]  ;;  %v3608_v10 = vpack.c.bf16 %v75_v7, %v67_v6 }
  0x2a   :  { %v2187_v17 = vld [vmem:[#allocation5] sm:$0xf]  ;;  %v3211_v18 = vld [vmem:[#allocation5 + $0xc] sm:$0xf0]  ;;  %v2588_v24 = vor.u32 %v3311_v15, %v2587_v14  ;;  %1656 = vmatpush.bf16.msra.mxu1 %v2332_v19  ;;  %v77_v11 = vld [vmem:[#allocation3 + $0x58] sm:$0xff] }
  0x2b   :  { %v2315_v21 = vld [vmem:[#allocation5 + $0x100] sm:$0xf]  ;;  %v3243_v22 = vld [vmem:[#allocation5 + $0x10c] sm:$0xf0]  ;;  %v2188_v31 = vor.u32 %v3211_v18, %v2187_v17  ;;  %1670 = vmatpush.bf16.msra.mxu2 %v2460_v20  ;;  %v3610_v17 = vpack.c.bf16 %v77_v11, %v69_v8 }
  0x2c   :  { %v2443_v23 = vld [vmem:[#allocation5 + $0x200] sm:$0xf]  ;;  %v3275_v25 = vld [vmem:[#allocation5 + $0x20c] sm:$0xf0]  ;;  %v2316_v35 = vor.u32 %v3243_v22, %v2315_v21  ;;  %1684 = vmatpush.bf16.msra.mxu3 %v2588_v24 }
  0x2d   :  { %v2571_v26 = vld [vmem:[#allocation5 + $0x300] sm:$0xf]  ;;  %v3307_v27 = vld [vmem:[#allocation5 + $0x30c] sm:$0xf0]  ;;  %v2444_v36 = vor.u32 %v3275_v25, %v2443_v23  ;;  %1643 = vmatpush.bf16.msra.mxu0 %v2188_v31 }
  0x2e   :  { %v2811_v28 = vld [vmem:[#allocation5 + $0x4e0] sm:$0xf]  ;;  %v3367_v29 = vld [vmem:[#allocation5 + $0x4ec] sm:$0xf0]  ;;  %v2572_v39 = vor.u32 %v3307_v27, %v2571_v26  ;;  %1657 = vmatpush.bf16.msra.mxu1 %v2316_v35 }
  0x2f   :  { %v2939_v30 = vld [vmem:[#allocation5 + $0x5e0] sm:$0xf]  ;;  %v3399_v32 = vld [vmem:[#allocation5 + $0x5ec] sm:$0xf0]  ;;  %v2812_v40 = vor.u32 %v3367_v29, %v2811_v28  ;;  %1671 = vmatpush.bf16.msra.mxu2 %v2444_v36 }
  0x30   :  { %v3067_v33 = vld [vmem:[#allocation5 + $0x6e0] sm:$0xf]  ;;  %v3431_v34 = vld [vmem:[#allocation5 + $0x6ec] sm:$0xf0]  ;;  %v2940_v43 = vor.u32 %v3399_v32, %v2939_v30  ;;  %1685 = vmatpush.bf16.msra.mxu3 %v2572_v39 }
  0x31   :  { %v3195_v37 = vld [vmem:[#allocation5 + $0x7e0] sm:$0xf]  ;;  %v3463_v38 = vld [vmem:[#allocation5 + $0x7ec] sm:$0xf0]  ;;  %v3068_v44 = vor.u32 %v3431_v34, %v3067_v33  ;;  %1692 = vmatpush.bf16.msrb.mxu0 %v2812_v40  ;;  %1658 = vmatmul.bf16.vlgmr.msra.gmra.mxu1 %v3608_v10 }
  0x32   :  { %v2795_v41 = vld [vmem:[#allocation5 + $0x4c0] sm:$0xf]  ;;  %v3363_v42 = vld [vmem:[#allocation5 + $0x4cc] sm:$0xf0]  ;;  %v3196_v48 = vor.u32 %v3463_v38, %v3195_v37  ;;  %1706 = vmatpush.bf16.msrb.mxu1 %v2940_v43 }
  0x33   :  { %v2923_v45 = vld [vmem:[#allocation5 + $0x5c0] sm:$0xf]  ;;  %v3395_v46 = vld [vmem:[#allocation5 + $0x5cc] sm:$0xf0]  ;;  %v2796_v55 = vor.u32 %v3363_v42, %v2795_v41  ;;  %1720 = vmatpush.bf16.msrb.mxu2 %v3068_v44  ;;  %1686 = vmatmul.bf16.vlgmr.msra.gmra.mxu3 %v3610_v17 }
  0x34   :  { %v3051_v47 = vld [vmem:[#allocation5 + $0x6c0] sm:$0xf]  ;;  %v3427_v49 = vld [vmem:[#allocation5 + $0x6cc] sm:$0xf0]  ;;  %v2924_v60 = vor.u32 %v3395_v46, %v2923_v45  ;;  %1734 = vmatpush.bf16.msrb.mxu3 %v3196_v48 }
  0x35   :  { %v3179_v50 = vld [vmem:[#allocation5 + $0x7c0] sm:$0xf]  ;;  %v3459_v51 = vld [vmem:[#allocation5 + $0x7cc] sm:$0xf0]  ;;  %v3052_v61 = vor.u32 %v3427_v49, %v3051_v47  ;;  %1693 = vmatpush.bf16.msrb.mxu0 %v2796_v55 }
  0x36   :  { %v66_v52 = vld [vmem:[#allocation3] sm:$0xff]  ;;  %v68_v54 = vld [vmem:[#allocation3 + $0x10] sm:$0xff]  ;;  %v3180_v2 = vor.u32 %v3459_v51, %v3179_v50  ;;  %1707 = vmatpush.bf16.msrb.mxu1 %v2924_v60 }
  0x37   :  { %v74_v53 = vld [vmem:[#allocation3 + $0x40] sm:$0xff]  ;;  %v3359_v57 = vld [vmem:[#allocation5 + $0x4ac] sm:$0xf0]  ;;  %1721 = vmatpush.bf16.msrb.mxu2 %v3052_v61 }
  0x38   :  { %v2779_v56 = vld [vmem:[#allocation5 + $0x4a0] sm:$0xf]  ;;  %v3602_v58 = vpack.c.bf16 %v74_v53, %v66_v52  ;;  %v76_v59 = vld [vmem:[#allocation3 + $0x50] sm:$0xff]  ;;  %1735 = vmatpush.bf16.msrb.mxu3 %v3180_v2 }
  0x39   :  { %v2907_v62 = vld [vmem:[#allocation5 + $0x5a0] sm:$0xf]  ;;  %v3391_v63 = vld [vmem:[#allocation5 + $0x5ac] sm:$0xf0]  ;;  %v3604_v1 = vpack.c.bf16 %v76_v59, %v68_v54  ;;  %v2780_v9 = vor.u32 %v3359_v57, %v2779_v56 }
  0x3a   :  { %v3035_v0 = vld [vmem:[#allocation5 + $0x6a0] sm:$0xf]  ;;  %v3423_v3 = vld [vmem:[#allocation5 + $0x6ac] sm:$0xf0]  ;;  %1644 = vmatmul.bf16.vlgmr.msra.gmra.mxu0 %v3602_v58  ;;  %v2908_v12 = vor.u32 %v3391_v63, %v2907_v62 }
  0x3b   :  { %v3163_v4 = vld [vmem:[#allocation5 + $0x7a0] sm:$0xf]  ;;  %v3455_v5 = vld [vmem:[#allocation5 + $0x7ac] sm:$0xf0]  ;;  %1672 = vmatmul.bf16.vlgmr.msra.gmra.mxu2 %v3604_v1  ;;  %v3036_v13 = vor.u32 %v3423_v3, %v3035_v0  ;;  %1694 = vmatpush.bf16.msrb.mxu0 %v2780_v9  ;;  %v3237_v9 = vld [vmem:[#allocation5 + $0xe4] sm:$0xf] }
  0x3c   :  { %v2763_v14 = vld [vmem:[#allocation5 + $0x480] sm:$0xf]  ;;  %v3355_v15 = vld [vmem:[#allocation5 + $0x48c] sm:$0xf0]  ;;  %v3164_v18 = vor.u32 %v3455_v5, %v3163_v4  ;;  %1708 = vmatpush.bf16.msrb.mxu1 %v2908_v12  ;;  %v2301_v12 = vld [vmem:[#allocation5 + $0xf0] sm:$0xf0] }
  0x3d   :  { %v2891_v16 = vld [vmem:[#allocation5 + $0x580] sm:$0xf]  ;;  %v3387_v19 = vld [vmem:[#allocation5 + $0x58c] sm:$0xf0]  ;;  %v2764_v24 = vor.u32 %v3355_v15, %v2763_v14  ;;  %1722 = vmatpush.bf16.msrb.mxu2 %v3036_v13  ;;  %v3269_v13 = vld [vmem:[#allocation5 + $0x1e4] sm:$0xf] }
  0x3e   :  { %v3019_v20 = vld [vmem:[#allocation5 + $0x680] sm:$0xf]  ;;  %v3419_v21 = vld [vmem:[#allocation5 + $0x68c] sm:$0xf0]  ;;  %v2892_v25 = vor.u32 %v3387_v19, %v2891_v16  ;;  %1736 = vmatpush.bf16.msrb.mxu3 %v3164_v18  ;;  %v2429_v14 = vld [vmem:[#allocation5 + $0x1f0] sm:$0xf0] }
  0x3f   :  { %v3147_v22 = vld [vmem:[#allocation5 + $0x780] sm:$0xf]  ;;  %v3451_v23 = vld [vmem:[#allocation5 + $0x78c] sm:$0xf0]  ;;  %v3020_v26 = vor.u32 %v3419_v21, %v3019_v20  ;;  %1695 = vmatpush.bf16.msrb.mxu0 %v2764_v24  ;;  %v3301_v15 = vld [vmem:[#allocation5 + $0x2e4] sm:$0xf] }
  0x40   :  { %v2747_v27 = vld [vmem:[#allocation5 + $0x460] sm:$0xf]  ;;  %v3351_v28 = vld [vmem:[#allocation5 + $0x46c] sm:$0xf0]  ;;  %v3148_v30 = vor.u32 %v3451_v23, %v3147_v22  ;;  %1709 = vmatpush.bf16.msrb.mxu1 %v2892_v25  ;;  %v2557_v16 = vld [vmem:[#allocation5 + $0x2f0] sm:$0xf0] }
  0x41   :  { %v2875_v29 = vld [vmem:[#allocation5 + $0x560] sm:$0xf]  ;;  %v3383_v31 = vld [vmem:[#allocation5 + $0x56c] sm:$0xf0]  ;;  %v2748_v36 = vor.u32 %v3351_v28, %v2747_v27  ;;  %1723 = vmatpush.bf16.msrb.mxu2 %v3020_v26  ;;  %v3333_v18 = vld [vmem:[#allocation5 + $0x3e4] sm:$0xf] }
  0x42   :  { %v3003_v32 = vld [vmem:[#allocation5 + $0x660] sm:$0xf]  ;;  %v3415_v33 = vld [vmem:[#allocation5 + $0x66c] sm:$0xf0]  ;;  %v2876_v37 = vor.u32 %v3383_v31, %v2875_v29  ;;  %1737 = vmatpush.bf16.msrb.mxu3 %v3148_v30  ;;  %v2685_v20 = vld [vmem:[#allocation5 + $0x3f0] sm:$0xf0]  ;;  %v2304_v29 = vor.u32 %v3237_v9, %v2301_v12 }
  0x43   :  { %v3131_v34 = vld [vmem:[#allocation5 + $0x760] sm:$0xf]  ;;  %v3447_v35 = vld [vmem:[#allocation5 + $0x76c] sm:$0xf0]  ;;  %v3004_v38 = vor.u32 %v3415_v33, %v3003_v32  ;;  %1696 = vmatpush.bf16.msrb.mxu0 %v2748_v36  ;;  %v71_v27 = vld [vmem:[#allocation3 + $0x28] sm:$0xff]  ;;  %v2432_v33 = vor.u32 %v3269_v13, %v2429_v14 }
  0x44   :  { %v2731_v39 = vld [vmem:[#allocation5 + $0x440] sm:$0xf]  ;;  %v3347_v40 = vld [vmem:[#allocation5 + $0x44c] sm:$0xf0]  ;;  %v3132_v42 = vor.u32 %v3447_v35, %v3131_v34  ;;  %1710 = vmatpush.bf16.msrb.mxu1 %v2876_v37  ;;  %v79_v30 = vld [vmem:[#allocation3 + $0x68] sm:$0xff]  ;;  %v2560_v34 = vor.u32 %v3301_v15, %v2557_v16 }
  0x45   :  { %v2859_v41 = vld [vmem:[#allocation5 + $0x540] sm:$0xf]  ;;  %v3379_v43 = vld [vmem:[#allocation5 + $0x54c] sm:$0xf0]  ;;  %v2732_v48 = vor.u32 %v3347_v40, %v2731_v39  ;;  %1724 = vmatpush.bf16.msrb.mxu2 %v3004_v38  ;;  %v73_v31 = vld [vmem:[#allocation3 + $0x38] sm:$0xff]  ;;  %v2688_v38 = vor.u32 %v3333_v18, %v2685_v20 }
  0x46   :  { %v2987_v44 = vld [vmem:[#allocation5 + $0x640] sm:$0xf]  ;;  %v3411_v45 = vld [vmem:[#allocation5 + $0x64c] sm:$0xf0]  ;;  %v2860_v50 = vor.u32 %v3379_v43, %v2859_v41  ;;  %1738 = vmatpush.bf16.msrb.mxu3 %v3132_v42  ;;  %v81_v32 = vld [vmem:[#allocation3 + $0x78] sm:$0xff] }
  0x47   :  { %v3115_v46 = vld [vmem:[#allocation5 + $0x740] sm:$0xf]  ;;  %v3443_v47 = vld [vmem:[#allocation5 + $0x74c] sm:$0xf0]  ;;  %v2988_v51 = vor.u32 %v3411_v45, %v2987_v44  ;;  %1697 = vmatpush.bf16.msrb.mxu0 %v2732_v48  ;;  %v3233_v35 = vld [vmem:[#allocation5 + $0xc4] sm:$0xf]  ;;  %v3618_v44 = vpack.c.bf16 %v79_v30, %v71_v27 }
  0x48   :  { %v2715_v49 = vld [vmem:[#allocation5 + $0x420] sm:$0xf]  ;;  %v3343_v52 = vld [vmem:[#allocation5 + $0x42c] sm:$0xf0]  ;;  %v3116_v55 = vor.u32 %v3443_v47, %v3115_v46  ;;  %1711 = vmatpush.bf16.msrb.mxu1 %v2860_v50  ;;  %v2285_v36 = vld [vmem:[#allocation5 + $0xd0] sm:$0xf0]  ;;  %v3620_v47 = vpack.c.bf16 %v81_v32, %v73_v31 }
  0x49   :  { %v2843_v53 = vld [vmem:[#allocation5 + $0x520] sm:$0xf]  ;;  %v3375_v54 = vld [vmem:[#allocation5 + $0x52c] sm:$0xf0]  ;;  %v2716_v63 = vor.u32 %v3343_v52, %v2715_v49  ;;  %1725 = vmatpush.bf16.msrb.mxu2 %v2988_v51  ;;  %v3265_v37 = vld [vmem:[#allocation5 + $0x1c4] sm:$0xf]  ;;  %v2288_v48 = vor.u32 %v3233_v35, %v2285_v36 }
  0x4a   :  { %v2971_v56 = vld [vmem:[#allocation5 + $0x620] sm:$0xf]  ;;  %v3407_v57 = vld [vmem:[#allocation5 + $0x62c] sm:$0xf0]  ;;  %v2844_v5 = vor.u32 %v3375_v54, %v2843_v53  ;;  %1739 = vmatpush.bf16.msrb.mxu3 %v3116_v55  ;;  %v2413_v40 = vld [vmem:[#allocation5 + $0x1d0] sm:$0xf0] }
  0x4b   :  { %v3099_v59 = vld [vmem:[#allocation5 + $0x720] sm:$0xf]  ;;  %v3439_v60 = vld [vmem:[#allocation5 + $0x72c] sm:$0xf0]  ;;  %v2972_v6 = vor.u32 %v3407_v57, %v2971_v56  ;;  %1698 = vmatpush.bf16.msrb.mxu0 %v2716_v63  ;;  %v3297_v41 = vld [vmem:[#allocation5 + $0x2c4] sm:$0xf]  ;;  %v2416_v49 = vor.u32 %v3265_v37, %v2413_v40 }
  0x4c   :  { %v2699_v61 = vld [vmem:[#allocation5 + $0x400] sm:$0xf]  ;;  %v3339_v62 = vld [vmem:[#allocation5 + $0x40c] sm:$0xf0]  ;;  %v3100_v11 = vor.u32 %v3439_v60, %v3099_v59  ;;  %1712 = vmatpush.bf16.msrb.mxu1 %v2844_v5  ;;  %v2541_v42 = vld [vmem:[#allocation5 + $0x2d0] sm:$0xf0] }
  0x4d   :  { %v2827_v0 = vld [vmem:[#allocation5 + $0x500] sm:$0xf]  ;;  %v3371_v2 = vld [vmem:[#allocation5 + $0x50c] sm:$0xf0]  ;;  %v2700_v19 = vor.u32 %v3339_v62, %v2699_v61  ;;  %1726 = vmatpush.bf16.msrb.mxu2 %v2972_v6  ;;  %v3329_v45 = vld [vmem:[#allocation5 + $0x3c4] sm:$0xf]  ;;  %v2544_v50 = vor.u32 %v3297_v41, %v2541_v42 }
  0x4e   :  { %v2955_v3 = vld [vmem:[#allocation5 + $0x600] sm:$0xf]  ;;  %v3403_v4 = vld [vmem:[#allocation5 + $0x60c] sm:$0xf0]  ;;  %v2828_v23 = vor.u32 %v3371_v2, %v2827_v0  ;;  %1740 = vmatpush.bf16.msrb.mxu3 %v3100_v11  ;;  %v2669_v46 = vld [vmem:[#allocation5 + $0x3d0] sm:$0xf0] }
  0x4f   :  { %v3083_v7 = vld [vmem:[#allocation5 + $0x700] sm:$0xf]  ;;  %v3435_v8 = vld [vmem:[#allocation5 + $0x70c] sm:$0xf0]  ;;  %v2956_v24 = vor.u32 %v3403_v4, %v2955_v3  ;;  %1699 = vmatpush.bf16.msrb.mxu0 %v2700_v19  ;;  %v3229_v51 = vld [vmem:[#allocation5 + $0xa4] sm:$0xf]  ;;  %v2672_v54 = vor.u32 %v3329_v45, %v2669_v46 }
  0x50   :  { %v70_v21 = vld [vmem:[#allocation3 + $0x20] sm:$0xff]  ;;  %v72_v25 = vld [vmem:[#allocation3 + $0x30] sm:$0xff]  ;;  %v3084_v28 = vor.u32 %v3435_v8, %v3083_v7  ;;  %1713 = vmatpush.bf16.msrb.mxu1 %v2828_v23 }
  0x51   :  { %v78_v22 = vld [vmem:[#allocation3 + $0x60] sm:$0xff]  ;;  %v80_v26 = vld [vmem:[#allocation3 + $0x70] sm:$0xff]  ;;  %1727 = vmatpush.bf16.msrb.mxu2 %v2956_v24 }
  0x52   :  { %v3614_v39 = vpack.c.bf16 %v78_v22, %v70_v21  ;;  %v3616_v43 = vpack.c.bf16 %v80_v26, %v72_v25  ;;  %1741 = vmatpush.bf16.msrb.mxu3 %v3084_v28  ;;  %v2269_v52 = vld [vmem:[#allocation5 + $0xb0] sm:$0xf0]  ;;  %v3261_v53 = vld [vmem:[#allocation5 + $0x1a4] sm:$0xf] }
  0x53   :  { %1748 = vmatpush.bf16.msra.mxu0 %v2304_v29  ;;  %v2397_v55 = vld [vmem:[#allocation5 + $0x1b0] sm:$0xf0]  ;;  %v3293_v56 = vld [vmem:[#allocation5 + $0x2a4] sm:$0xf]  ;;  %1714 = vmatmul.bf16.vlgmr.msrb.gmra.mxu1 %v3618_v44  ;;  %v2272_v61 = vor.u32 %v3229_v51, %v2269_v52 }
  0x54   :  { %1762 = vmatpush.bf16.msra.mxu1 %v2432_v33  ;;  %1700 = vmatmul.bf16.vlgmr.msrb.gmra.mxu0 %v3614_v39  ;;  %v2525_v57 = vld [vmem:[#allocation5 + $0x2b0] sm:$0xf0]  ;;  %v3325_v59 = vld [vmem:[#allocation5 + $0x3a4] sm:$0xf]  ;;  %v2400_v62 = vor.u32 %v3261_v53, %v2397_v55 }
  0x55   :  { %1776 = vmatpush.bf16.msra.mxu2 %v2560_v34  ;;  %v2653_v60 = vld [vmem:[#allocation5 + $0x3b0] sm:$0xf0]  ;;  %1742 = vmatmul.bf16.vlgmr.msrb.gmra.mxu3 %v3620_v47  ;;  %v2528_v63 = vor.u32 %v3293_v56, %v2525_v57  ;;  %v3225_v0 = vld [vmem:[#allocation5 + $0x84] sm:$0xf] }
  0x56   :  { %1790 = vmatpush.bf16.msra.mxu3 %v2688_v38  ;;  %1728 = vmatmul.bf16.vlgmr.msrb.gmra.mxu2 %v3616_v43  ;;  %v2253_v2 = vld [vmem:[#allocation5 + $0x90] sm:$0xf0]  ;;  %v3257_v3 = vld [vmem:[#allocation5 + $0x184] sm:$0xf]  ;;  %v2656_v4 = vor.u32 %v3325_v59, %v2653_v60 }
  0x57   :  { %1749 = vmatpush.bf16.msra.mxu0 %v2288_v48  ;;  %v2381_v5 = vld [vmem:[#allocation5 + $0x190] sm:$0xf0]  ;;  %v3289_v6 = vld [vmem:[#allocation5 + $0x284] sm:$0xf]  ;;  %v2256_v11 = vor.u32 %v3225_v0, %v2253_v2 }
  0x58   :  { %1763 = vmatpush.bf16.msra.mxu1 %v2416_v49  ;;  %v2509_v7 = vld [vmem:[#allocation5 + $0x290] sm:$0xf0]  ;;  %v3321_v8 = vld [vmem:[#allocation5 + $0x384] sm:$0xf]  ;;  %v2384_v12 = vor.u32 %v3257_v3, %v2381_v5 }
  0x59   :  { %1777 = vmatpush.bf16.msra.mxu2 %v2544_v50  ;;  %v2637_v9 = vld [vmem:[#allocation5 + $0x390] sm:$0xf0]  ;;  %v2512_v13 = vor.u32 %v3289_v6, %v2509_v7  ;;  %v3221_v14 = vld [vmem:[#allocation5 + $0x64] sm:$0xf] }
  0x5a   :  { %1791 = vmatpush.bf16.msra.mxu3 %v2672_v54  ;;  %v2237_v15 = vld [vmem:[#allocation5 + $0x70] sm:$0xf0]  ;;  %v3253_v16 = vld [vmem:[#allocation5 + $0x164] sm:$0xf]  ;;  %v2640_v18 = vor.u32 %v3321_v8, %v2637_v9 }
  0x5b   :  { %1750 = vmatpush.bf16.msra.mxu0 %v2272_v61  ;;  %v2365_v19 = vld [vmem:[#allocation5 + $0x170] sm:$0xf0]  ;;  %v3285_v20 = vld [vmem:[#allocation5 + $0x264] sm:$0xf]  ;;  %v2240_v24 = vor.u32 %v3221_v14, %v2237_v15 }
  0x5c   :  { %1764 = vmatpush.bf16.msra.mxu1 %v2400_v62  ;;  %v2493_v21 = vld [vmem:[#allocation5 + $0x270] sm:$0xf0]  ;;  %v3317_v22 = vld [vmem:[#allocation5 + $0x364] sm:$0xf]  ;;  %v2368_v25 = vor.u32 %v3253_v16, %v2365_v19 }
  0x5d   :  { %1778 = vmatpush.bf16.msra.mxu2 %v2528_v63  ;;  %v2621_v23 = vld [vmem:[#allocation5 + $0x370] sm:$0xf0]  ;;  %v2496_v26 = vor.u32 %v3285_v20, %v2493_v21  ;;  %v3217_v27 = vld [vmem:[#allocation5 + $0x44] sm:$0xf] }
  0x5e   :  { %1792 = vmatpush.bf16.msra.mxu3 %v2656_v4  ;;  %v2221_v28 = vld [vmem:[#allocation5 + $0x50] sm:$0xf0]  ;;  %v3249_v29 = vld [vmem:[#allocation5 + $0x144] sm:$0xf]  ;;  %v2624_v30 = vor.u32 %v3317_v22, %v2621_v23 }
  0x5f   :  { %1751 = vmatpush.bf16.msra.mxu0 %v2256_v11  ;;  %v2349_v31 = vld [vmem:[#allocation5 + $0x150] sm:$0xf0]  ;;  %v3281_v32 = vld [vmem:[#allocation5 + $0x244] sm:$0xf]  ;;  %v2224_v36 = vor.u32 %v3217_v27, %v2221_v28 }
  0x60   :  { %1765 = vmatpush.bf16.msra.mxu1 %v2384_v12  ;;  %v2477_v33 = vld [vmem:[#allocation5 + $0x250] sm:$0xf0]  ;;  %v3313_v34 = vld [vmem:[#allocation5 + $0x344] sm:$0xf]  ;;  %v2352_v37 = vor.u32 %v3249_v29, %v2349_v31 }
  0x61   :  { %1779 = vmatpush.bf16.msra.mxu2 %v2512_v13  ;;  %v2605_v35 = vld [vmem:[#allocation5 + $0x350] sm:$0xf0]  ;;  %v2480_v38 = vor.u32 %v3281_v32, %v2477_v33  ;;  %v3213_v40 = vld [vmem:[#allocation5 + $0x24] sm:$0xf] }
  0x62   :  { %1793 = vmatpush.bf16.msra.mxu3 %v2640_v18  ;;  %v2205_v41 = vld [vmem:[#allocation5 + $0x30] sm:$0xf0]  ;;  %v3245_v42 = vld [vmem:[#allocation5 + $0x124] sm:$0xf]  ;;  %v2608_v45 = vor.u32 %v3313_v34, %v2605_v35 }
  0x63   :  { %1752 = vmatpush.bf16.msra.mxu0 %v2240_v24  ;;  %v2333_v46 = vld [vmem:[#allocation5 + $0x130] sm:$0xf0]  ;;  %v3277_v48 = vld [vmem:[#allocation5 + $0x224] sm:$0xf]  ;;  %v2208_v52 = vor.u32 %v3213_v40, %v2205_v41 }
  0x64   :  { %1766 = vmatpush.bf16.msra.mxu1 %v2368_v25  ;;  %v2461_v49 = vld [vmem:[#allocation5 + $0x230] sm:$0xf0]  ;;  %v3309_v50 = vld [vmem:[#allocation5 + $0x324] sm:$0xf]  ;;  %v2336_v55 = vor.u32 %v3245_v42, %v2333_v46 }
  0x65   :  { %1780 = vmatpush.bf16.msra.mxu2 %v2496_v26  ;;  %v2589_v51 = vld [vmem:[#allocation5 + $0x330] sm:$0xf0]  ;;  %v3209_v53 = vld [vmem:[#allocation5 + $0x4] sm:$0xf]  ;;  %v2464_v56 = vor.u32 %v3277_v48, %v2461_v49 }
  0x66   :  { %1794 = vmatpush.bf16.msra.mxu3 %v2624_v30  ;;  %v2189_v54 = vld [vmem:[#allocation5 + $0x10] sm:$0xf0]  ;;  %v3241_v57 = vld [vmem:[#allocation5 + $0x104] sm:$0xf]  ;;  %v2592_v61 = vor.u32 %v3309_v50, %v2589_v51 }
  0x67   :  { %1753 = vmatpush.bf16.msra.mxu0 %v2224_v36  ;;  %v2317_v59 = vld [vmem:[#allocation5 + $0x110] sm:$0xf0]  ;;  %v3273_v60 = vld [vmem:[#allocation5 + $0x204] sm:$0xf]  ;;  %v2192_v5 = vor.u32 %v3209_v53, %v2189_v54 }
  0x68   :  { %1767 = vmatpush.bf16.msra.mxu1 %v2352_v37  ;;  %v2445_v62 = vld [vmem:[#allocation5 + $0x210] sm:$0xf0]  ;;  %v3305_v63 = vld [vmem:[#allocation5 + $0x304] sm:$0xf]  ;;  %v2320_v9 = vor.u32 %v3241_v57, %v2317_v59 }
  0x69   :  { %1781 = vmatpush.bf16.msra.mxu2 %v2480_v38  ;;  %v2573_v0 = vld [vmem:[#allocation5 + $0x310] sm:$0xf0]  ;;  %v3365_v2 = vld [vmem:[#allocation5 + $0x4e4] sm:$0xf]  ;;  %v2448_v11 = vor.u32 %v3273_v60, %v2445_v62 }
  0x6a   :  { %1795 = vmatpush.bf16.msra.mxu3 %v2608_v45  ;;  %v2813_v3 = vld [vmem:[#allocation5 + $0x4f0] sm:$0xf0]  ;;  %v3397_v4 = vld [vmem:[#allocation5 + $0x5e4] sm:$0xf]  ;;  %v2576_v14 = vor.u32 %v3305_v63, %v2573_v0 }
  0x6b   :  { %1754 = vmatpush.bf16.msra.mxu0 %v2208_v52  ;;  %v2941_v6 = vld [vmem:[#allocation5 + $0x5f0] sm:$0xf0]  ;;  %v3429_v7 = vld [vmem:[#allocation5 + $0x6e4] sm:$0xf]  ;;  %v2816_v15 = vor.u32 %v3365_v2, %v2813_v3 }
  0x6c   :  { %v3069_v8 = vld [vmem:[#allocation5 + $0x6f0] sm:$0xf0]  ;;  %1768 = vmatpush.bf16.msra.mxu1 %v2336_v55  ;;  %v3461_v12 = vld [vmem:[#allocation5 + $0x7e4] sm:$0xf]  ;;  %v2944_v16 = vor.u32 %v3397_v4, %v2941_v6 }
  0x6d   :  { %1782 = vmatpush.bf16.msra.mxu2 %v2464_v56  ;;  %v3197_v13 = vld [vmem:[#allocation5 + $0x7f0] sm:$0xf0]  ;;  %v3072_v18 = vor.u32 %v3429_v7, %v3069_v8  ;;  %v3361_v19 = vld [vmem:[#allocation5 + $0x4c4] sm:$0xf] }
  0x6e   :  { %1796 = vmatpush.bf16.msra.mxu3 %v2592_v61  ;;  %v2797_v20 = vld [vmem:[#allocation5 + $0x4d0] sm:$0xf0]  ;;  %v3393_v21 = vld [vmem:[#allocation5 + $0x5c4] sm:$0xf]  ;;  %v3200_v22 = vor.u32 %v3461_v12, %v3197_v13 }
  0x6f   :  { %1755 = vmatpush.bf16.msra.mxu0 %v2192_v5  ;;  %v2925_v23 = vld [vmem:[#allocation5 + $0x5d0] sm:$0xf0]  ;;  %v3425_v24 = vld [vmem:[#allocation5 + $0x6c4] sm:$0xf]  ;;  %v2800_v28 = vor.u32 %v3361_v19, %v2797_v20 }
  0x70   :  { %v3053_v25 = vld [vmem:[#allocation5 + $0x6d0] sm:$0xf0]  ;;  %1769 = vmatpush.bf16.msra.mxu1 %v2320_v9  ;;  %v3457_v26 = vld [vmem:[#allocation5 + $0x7c4] sm:$0xf]  ;;  %v2928_v29 = vor.u32 %v3393_v21, %v2925_v23 }
  0x71   :  { %1783 = vmatpush.bf16.msra.mxu2 %v2448_v11  ;;  %v3181_v27 = vld [vmem:[#allocation5 + $0x7d0] sm:$0xf0]  ;;  %v3056_v30 = vor.u32 %v3425_v24, %v3053_v25  ;;  %v3357_v31 = vld [vmem:[#allocation5 + $0x4a4] sm:$0xf] }
  0x72   :  { %1797 = vmatpush.bf16.msra.mxu3 %v2576_v14  ;;  %v2781_v32 = vld [vmem:[#allocation5 + $0x4b0] sm:$0xf0]  ;;  %v3389_v33 = vld [vmem:[#allocation5 + $0x5a4] sm:$0xf]  ;;  %v3184_v34 = vor.u32 %v3457_v26, %v3181_v27  ;;  %1756 = vmatmul.bf16.vlgmr.msra.gmra.mxu0 %v3602_v58 }
  0x73   :  { %1804 = vmatpush.bf16.msrb.mxu0 %v2816_v15  ;;  %v2909_v35 = vld [vmem:[#allocation5 + $0x5b0] sm:$0xf0]  ;;  %v3421_v36 = vld [vmem:[#allocation5 + $0x6a4] sm:$0xf]  ;;  %1770 = vmatmul.bf16.vlgmr.msra.gmra.mxu1 %v3608_v10  ;;  %v2784_v41 = vor.u32 %v3357_v31, %v2781_v32 }
  0x74   :  { %1818 = vmatpush.bf16.msrb.mxu1 %v2944_v16  ;;  %v3037_v37 = vld [vmem:[#allocation5 + $0x6b0] sm:$0xf0]  ;;  %v3453_v38 = vld [vmem:[#allocation5 + $0x7a4] sm:$0xf]  ;;  %1784 = vmatmul.bf16.vlgmr.msra.gmra.mxu2 %v3604_v1  ;;  %v2912_v42 = vor.u32 %v3389_v33, %v2909_v35 }
  0x75   :  { %1832 = vmatpush.bf16.msrb.mxu2 %v3072_v18  ;;  %v3165_v40 = vld [vmem:[#allocation5 + $0x7b0] sm:$0xf0]  ;;  %1798 = vmatmul.bf16.vlgmr.msra.gmra.mxu3 %v3610_v17  ;;  %v3040_v45 = vor.u32 %v3421_v36, %v3037_v37  ;;  %v3353_v46 = vld [vmem:[#allocation5 + $0x484] sm:$0xf] }
  0x76   :  { %1846 = vmatpush.bf16.msrb.mxu3 %v3200_v22  ;;  %v2765_v48 = vld [vmem:[#allocation5 + $0x490] sm:$0xf0]  ;;  %v3385_v49 = vld [vmem:[#allocation5 + $0x584] sm:$0xf]  ;;  %v3168_v50 = vor.u32 %v3453_v38, %v3165_v40 }
  0x77   :  { %1805 = vmatpush.bf16.msrb.mxu0 %v2800_v28  ;;  %v2893_v51 = vld [vmem:[#allocation5 + $0x590] sm:$0xf0]  ;;  %v3417_v52 = vld [vmem:[#allocation5 + $0x684] sm:$0xf]  ;;  %v2768_v56 = vor.u32 %v3353_v46, %v2765_v48  ;;  %v2307_v48 = vld [vmem:[#allocation5 + $0xe8] sm:$0xf] }
  0x78   :  { %1819 = vmatpush.bf16.msrb.mxu1 %v2928_v29  ;;  %v3021_v53 = vld [vmem:[#allocation5 + $0x690] sm:$0xf0]  ;;  %v3449_v54 = vld [vmem:[#allocation5 + $0x784] sm:$0xf]  ;;  %v2896_v57 = vor.u32 %v3385_v49, %v2893_v51  ;;  %v3240_v49 = vld [vmem:[#allocation5 + $0xf4] sm:$0xf0] }
  0x79   :  { %1833 = vmatpush.bf16.msrb.mxu2 %v3056_v30  ;;  %v3149_v55 = vld [vmem:[#allocation5 + $0x790] sm:$0xf0]  ;;  %v3024_v59 = vor.u32 %v3417_v52, %v3021_v53  ;;  %v3349_v60 = vld [vmem:[#allocation5 + $0x464] sm:$0xf]  ;;  %v3272_v52 = vld [vmem:[#allocation5 + $0x1f4] sm:$0xf0] }
  0x7a   :  { %1847 = vmatpush.bf16.msrb.mxu3 %v3184_v34  ;;  %v2749_v61 = vld [vmem:[#allocation5 + $0x470] sm:$0xf0]  ;;  %v3381_v62 = vld [vmem:[#allocation5 + $0x564] sm:$0xf]  ;;  %v3152_v63 = vor.u32 %v3449_v54, %v3149_v55  ;;  %v2563_v53 = vld [vmem:[#allocation5 + $0x2e8] sm:$0xf] }
  0x7b   :  { %1806 = vmatpush.bf16.msrb.mxu0 %v2784_v41  ;;  %v2877_v0 = vld [vmem:[#allocation5 + $0x570] sm:$0xf0]  ;;  %v3413_v2 = vld [vmem:[#allocation5 + $0x664] sm:$0xf]  ;;  %v2752_v6 = vor.u32 %v3349_v60, %v2749_v61  ;;  %v3304_v54 = vld [vmem:[#allocation5 + $0x2f4] sm:$0xf0]  ;;  %v2308_v61 = vor.u32 %v3240_v49, %v2307_v48 }
  0x7c   :  { %1820 = vmatpush.bf16.msrb.mxu1 %v2912_v42  ;;  %v3005_v3 = vld [vmem:[#allocation5 + $0x670] sm:$0xf0]  ;;  %v3445_v4 = vld [vmem:[#allocation5 + $0x764] sm:$0xf]  ;;  %v2880_v7 = vor.u32 %v3381_v62, %v2877_v0  ;;  %v2291_v0 = vld [vmem:[#allocation5 + $0xc8] sm:$0xf] }
  0x7d   :  { %1834 = vmatpush.bf16.msrb.mxu2 %v3040_v45  ;;  %v3133_v5 = vld [vmem:[#allocation5 + $0x770] sm:$0xf0]  ;;  %v3008_v8 = vor.u32 %v3413_v2, %v3005_v3  ;;  %v3345_v9 = vld [vmem:[#allocation5 + $0x444] sm:$0xf]  ;;  %v3236_v2 = vld [vmem:[#allocation5 + $0xd4] sm:$0xf0] }
  0x7e   :  { %1848 = vmatpush.bf16.msrb.mxu3 %v3168_v50  ;;  %v2733_v11 = vld [vmem:[#allocation5 + $0x450] sm:$0xf0]  ;;  %v3377_v12 = vld [vmem:[#allocation5 + $0x544] sm:$0xf]  ;;  %v3136_v13 = vor.u32 %v3445_v4, %v3133_v5  ;;  %v2435_v50 = vld [vmem:[#allocation5 + $0x1e8] sm:$0xf] }
  0x7f   :  { %1807 = vmatpush.bf16.msrb.mxu0 %v2768_v56  ;;  %v2861_v14 = vld [vmem:[#allocation5 + $0x550] sm:$0xf0]  ;;  %v3409_v15 = vld [vmem:[#allocation5 + $0x644] sm:$0xf]  ;;  %v2736_v20 = vor.u32 %v3345_v9, %v2733_v11  ;;  %v2436_v62 = vor.u32 %v3272_v52, %v2435_v50  ;;  %v2419_v3 = vld [vmem:[#allocation5 + $0x1c8] sm:$0xf]  ;;  %v2292_v11 = vor.u32 %v3236_v2, %v2291_v0 }
  0x80   :  { %1821 = vmatpush.bf16.msrb.mxu1 %v2896_v57  ;;  %v2989_v16 = vld [vmem:[#allocation5 + $0x650] sm:$0xf0]  ;;  %v3441_v18 = vld [vmem:[#allocation5 + $0x744] sm:$0xf]  ;;  %v2864_v21 = vor.u32 %v3377_v12, %v2861_v14  ;;  %v2691_v57 = vld [vmem:[#allocation5 + $0x3e8] sm:$0xf] }
  0x81   :  { %1835 = vmatpush.bf16.msrb.mxu2 %v3024_v59  ;;  %v3117_v19 = vld [vmem:[#allocation5 + $0x750] sm:$0xf0]  ;;  %v2992_v22 = vor.u32 %v3409_v15, %v2989_v16  ;;  %v3341_v23 = vld [vmem:[#allocation5 + $0x424] sm:$0xf]  ;;  %v3336_v59 = vld [vmem:[#allocation5 + $0x3f4] sm:$0xf0] }
  0x82   :  { %1849 = vmatpush.bf16.msrb.mxu3 %v3152_v63  ;;  %v2717_v24 = vld [vmem:[#allocation5 + $0x430] sm:$0xf0]  ;;  %v3373_v25 = vld [vmem:[#allocation5 + $0x524] sm:$0xf]  ;;  %v3120_v26 = vor.u32 %v3441_v18, %v3117_v19  ;;  %v2564_v63 = vor.u32 %v3304_v54, %v2563_v53  ;;  %v2692_v4 = vor.u32 %v3336_v59, %v2691_v57  ;;  %v3268_v5 = vld [vmem:[#allocation5 + $0x1d4] sm:$0xf0] }
  0x83   :  { %1808 = vmatpush.bf16.msrb.mxu0 %v2752_v6  ;;  %v2845_v27 = vld [vmem:[#allocation5 + $0x530] sm:$0xf0]  ;;  %v3405_v28 = vld [vmem:[#allocation5 + $0x624] sm:$0xf]  ;;  %v2720_v32 = vor.u32 %v3341_v23, %v2717_v24  ;;  %v2547_v6 = vld [vmem:[#allocation5 + $0x2c8] sm:$0xf]  ;;  %v2420_v12 = vor.u32 %v3268_v5, %v2419_v3 }
  0x84   :  { %1822 = vmatpush.bf16.msrb.mxu1 %v2880_v7  ;;  %v2973_v29 = vld [vmem:[#allocation5 + $0x630] sm:$0xf0]  ;;  %v3437_v30 = vld [vmem:[#allocation5 + $0x724] sm:$0xf]  ;;  %v2848_v35 = vor.u32 %v3373_v25, %v2845_v27  ;;  %v3300_v7 = vld [vmem:[#allocation5 + $0x2d4] sm:$0xf0] }
  0x85   :  { %1836 = vmatpush.bf16.msrb.mxu2 %v3008_v8  ;;  %v3101_v31 = vld [vmem:[#allocation5 + $0x730] sm:$0xf0]  ;;  %v3337_v33 = vld [vmem:[#allocation5 + $0x404] sm:$0xf]  ;;  %v2976_v36 = vor.u32 %v3405_v28, %v2973_v29  ;;  %v2675_v8 = vld [vmem:[#allocation5 + $0x3c8] sm:$0xf] }
  0x86   :  { %1850 = vmatpush.bf16.msrb.mxu3 %v3136_v13  ;;  %v2701_v34 = vld [vmem:[#allocation5 + $0x410] sm:$0xf0]  ;;  %v3369_v37 = vld [vmem:[#allocation5 + $0x504] sm:$0xf]  ;;  %v3104_v41 = vor.u32 %v3437_v30, %v3101_v31  ;;  %v3332_v9 = vld [vmem:[#allocation5 + $0x3d4] sm:$0xf0]  ;;  %v2548_v13 = vor.u32 %v3300_v7, %v2547_v6 }
  0x87   :  { %1809 = vmatpush.bf16.msrb.mxu0 %v2736_v20  ;;  %v2829_v38 = vld [vmem:[#allocation5 + $0x510] sm:$0xf0]  ;;  %v3401_v40 = vld [vmem:[#allocation5 + $0x604] sm:$0xf]  ;;  %v2704_v51 = vor.u32 %v3337_v33, %v2701_v34  ;;  %v2275_v14 = vld [vmem:[#allocation5 + $0xa8] sm:$0xf]  ;;  %v2676_v18 = vor.u32 %v3332_v9, %v2675_v8 }
  0x88   :  { %1823 = vmatpush.bf16.msrb.mxu1 %v2864_v21  ;;  %v2957_v42 = vld [vmem:[#allocation5 + $0x610] sm:$0xf0]  ;;  %v3433_v45 = vld [vmem:[#allocation5 + $0x704] sm:$0xf]  ;;  %v2832_v55 = vor.u32 %v3369_v37, %v2829_v38  ;;  %v3232_v15 = vld [vmem:[#allocation5 + $0xb4] sm:$0xf0] }
  0x89   :  { %1837 = vmatpush.bf16.msrb.mxu2 %v2992_v22  ;;  %v3085_v46 = vld [vmem:[#allocation5 + $0x710] sm:$0xf0]  ;;  %v2960_v56 = vor.u32 %v3401_v40, %v2957_v42  ;;  %v2403_v16 = vld [vmem:[#allocation5 + $0x1a8] sm:$0xf]  ;;  %v3264_v19 = vld [vmem:[#allocation5 + $0x1b4] sm:$0xf0]  ;;  %v2276_v24 = vor.u32 %v3232_v15, %v2275_v14 }
  0x8a   :  { %1851 = vmatpush.bf16.msrb.mxu3 %v3120_v26  ;;  %v3088_v60 = vor.u32 %v3433_v45, %v3085_v46  ;;  %v2531_v20 = vld [vmem:[#allocation5 + $0x2a8] sm:$0xf]  ;;  %v3296_v21 = vld [vmem:[#allocation5 + $0x2b4] sm:$0xf0]  ;;  %v2404_v25 = vor.u32 %v3264_v19, %v2403_v16 }
  0x8b   :  { %1810 = vmatpush.bf16.msrb.mxu0 %v2720_v32  ;;  %v2659_v22 = vld [vmem:[#allocation5 + $0x3a8] sm:$0xf]  ;;  %v3328_v23 = vld [vmem:[#allocation5 + $0x3b4] sm:$0xf0]  ;;  %v2532_v26 = vor.u32 %v3296_v21, %v2531_v20 }
  0x8c   :  { %1824 = vmatpush.bf16.msrb.mxu1 %v2848_v35  ;;  %v2259_v27 = vld [vmem:[#allocation5 + $0x88] sm:$0xf]  ;;  %v3228_v28 = vld [vmem:[#allocation5 + $0x94] sm:$0xf0]  ;;  %v2660_v30 = vor.u32 %v3328_v23, %v2659_v22 }
  0x8d   :  { %1838 = vmatpush.bf16.msrb.mxu2 %v2976_v36  ;;  %v2387_v29 = vld [vmem:[#allocation5 + $0x188] sm:$0xf]  ;;  %v3260_v31 = vld [vmem:[#allocation5 + $0x194] sm:$0xf0]  ;;  %v2260_v36 = vor.u32 %v3228_v28, %v2259_v27 }
  0x8e   :  { %1852 = vmatpush.bf16.msrb.mxu3 %v3104_v41  ;;  %v2515_v32 = vld [vmem:[#allocation5 + $0x288] sm:$0xf]  ;;  %v3292_v33 = vld [vmem:[#allocation5 + $0x294] sm:$0xf0]  ;;  %v2388_v37 = vor.u32 %v3260_v31, %v2387_v29 }
  0x8f   :  { %1811 = vmatpush.bf16.msrb.mxu0 %v2704_v51  ;;  %v2643_v34 = vld [vmem:[#allocation5 + $0x388] sm:$0xf]  ;;  %v3324_v35 = vld [vmem:[#allocation5 + $0x394] sm:$0xf0]  ;;  %v2516_v38 = vor.u32 %v3292_v33, %v2515_v32 }
  0x90   :  { %1825 = vmatpush.bf16.msrb.mxu1 %v2832_v55  ;;  %v2243_v40 = vld [vmem:[#allocation5 + $0x68] sm:$0xf]  ;;  %v3224_v41 = vld [vmem:[#allocation5 + $0x74] sm:$0xf0]  ;;  %v2644_v45 = vor.u32 %v3324_v35, %v2643_v34 }
  0x91   :  { %1839 = vmatpush.bf16.msrb.mxu2 %v2960_v56  ;;  %v2371_v42 = vld [vmem:[#allocation5 + $0x168] sm:$0xf]  ;;  %v3256_v46 = vld [vmem:[#allocation5 + $0x174] sm:$0xf0]  ;;  %v2244_v52 = vor.u32 %v3224_v41, %v2243_v40 }
  0x92   :  { %1853 = vmatpush.bf16.msrb.mxu3 %v3088_v60  ;;  %1812 = vmatmul.bf16.vlgmr.msrb.gmra.mxu0 %v3614_v39  ;;  %v2499_v48 = vld [vmem:[#allocation5 + $0x268] sm:$0xf]  ;;  %v3288_v49 = vld [vmem:[#allocation5 + $0x274] sm:$0xf0]  ;;  %v2372_v53 = vor.u32 %v3256_v46, %v2371_v42 }
  0x93   :  { %1860 = vmatpush.bf16.msra.mxu0 %v2308_v61  ;;  %1826 = vmatmul.bf16.vlgmr.msrb.gmra.mxu1 %v3618_v44  ;;  %v2627_v50 = vld [vmem:[#allocation5 + $0x368] sm:$0xf]  ;;  %v3320_v51 = vld [vmem:[#allocation5 + $0x374] sm:$0xf0]  ;;  %v2500_v54 = vor.u32 %v3288_v49, %v2499_v48 }
  0x94   :  { %1874 = vmatpush.bf16.msra.mxu1 %v2436_v62  ;;  %1840 = vmatmul.bf16.vlgmr.msrb.gmra.mxu2 %v3616_v43  ;;  %v2227_v55 = vld [vmem:[#allocation5 + $0x48] sm:$0xf]  ;;  %v3220_v56 = vld [vmem:[#allocation5 + $0x54] sm:$0xf0]  ;;  %v2628_v59 = vor.u32 %v3320_v51, %v2627_v50 }
  0x95   :  { %1888 = vmatpush.bf16.msra.mxu2 %v2564_v63  ;;  %1854 = vmatmul.bf16.vlgmr.msrb.gmra.mxu3 %v3620_v47  ;;  %v2355_v57 = vld [vmem:[#allocation5 + $0x148] sm:$0xf]  ;;  %v3252_v60 = vld [vmem:[#allocation5 + $0x154] sm:$0xf0]  ;;  %v2228_v2 = vor.u32 %v3220_v56, %v2227_v55 }
  0x96   :  { %1902 = vmatpush.bf16.msra.mxu3 %v2692_v4  ;;  %v2483_v61 = vld [vmem:[#allocation5 + $0x248] sm:$0xf]  ;;  %v3284_v62 = vld [vmem:[#allocation5 + $0x254] sm:$0xf0]  ;;  %v2356_v3 = vor.u32 %v3252_v60, %v2355_v57 }
  0x97   :  { %1861 = vmatpush.bf16.msra.mxu0 %v2292_v11  ;;  %v2611_v63 = vld [vmem:[#allocation5 + $0x348] sm:$0xf]  ;;  %v3316_v0 = vld [vmem:[#allocation5 + $0x354] sm:$0xf0]  ;;  %v2484_v4 = vor.u32 %v3284_v62, %v2483_v61 }
  0x98   :  { %1875 = vmatpush.bf16.msra.mxu1 %v2420_v12  ;;  %v2211_v5 = vld [vmem:[#allocation5 + $0x28] sm:$0xf]  ;;  %v3216_v6 = vld [vmem:[#allocation5 + $0x34] sm:$0xf0]  ;;  %v2612_v8 = vor.u32 %v3316_v0, %v2611_v63  ;;  %v3634_v63 = vld [vmem:[#allocation7] sm:$0xf] }
  0x99   :  { %1889 = vmatpush.bf16.msra.mxu2 %v2548_v13  ;;  %v2339_v7 = vld [vmem:[#allocation5 + $0x128] sm:$0xf]  ;;  %v3248_v9 = vld [vmem:[#allocation5 + $0x134] sm:$0xf0]  ;;  %v2212_v15 = vor.u32 %v3216_v6, %v2211_v5 }
  0x9a   :  { %1903 = vmatpush.bf16.msra.mxu3 %v2676_v18  ;;  %v2467_v11 = vld [vmem:[#allocation5 + $0x228] sm:$0xf]  ;;  %v3280_v12 = vld [vmem:[#allocation5 + $0x234] sm:$0xf0]  ;;  %v2340_v19 = vor.u32 %v3248_v9, %v2339_v7 }
  0x9b   :  { %1862 = vmatpush.bf16.msra.mxu0 %v2276_v24  ;;  %v2595_v13 = vld [vmem:[#allocation5 + $0x328] sm:$0xf]  ;;  %v3312_v14 = vld [vmem:[#allocation5 + $0x334] sm:$0xf0]  ;;  %v2468_v20 = vor.u32 %v3280_v12, %v2467_v11 }
  0x9c   :  { %1876 = vmatpush.bf16.msra.mxu1 %v2404_v25  ;;  %v2195_v16 = vld [vmem:[#allocation5 + $0x8] sm:$0xf]  ;;  %v3212_v18 = vld [vmem:[#allocation5 + $0x14] sm:$0xf0]  ;;  %v2596_v24 = vor.u32 %v3312_v14, %v2595_v13 }
  0x9d   :  { %1890 = vmatpush.bf16.msra.mxu2 %v2532_v26  ;;  %v2323_v21 = vld [vmem:[#allocation5 + $0x108] sm:$0xf]  ;;  %v3244_v22 = vld [vmem:[#allocation5 + $0x114] sm:$0xf0]  ;;  %v2196_v31 = vor.u32 %v3212_v18, %v2195_v16 }
  0x9e   :  { %1904 = vmatpush.bf16.msra.mxu3 %v2660_v30  ;;  %v2451_v23 = vld [vmem:[#allocation5 + $0x208] sm:$0xf]  ;;  %v3276_v25 = vld [vmem:[#allocation5 + $0x214] sm:$0xf0]  ;;  %v2324_v35 = vor.u32 %v3244_v22, %v2323_v21 }
  0x9f   :  { %1863 = vmatpush.bf16.msra.mxu0 %v2260_v36  ;;  %v2579_v26 = vld [vmem:[#allocation5 + $0x308] sm:$0xf]  ;;  %v3308_v27 = vld [vmem:[#allocation5 + $0x314] sm:$0xf0]  ;;  %v2452_v36 = vor.u32 %v3276_v25, %v2451_v23 }
  0xa0   :  { %1877 = vmatpush.bf16.msra.mxu1 %v2388_v37  ;;  %v2819_v28 = vld [vmem:[#allocation5 + $0x4e8] sm:$0xf]  ;;  %v3368_v29 = vld [vmem:[#allocation5 + $0x4f4] sm:$0xf0]  ;;  %v2580_v40 = vor.u32 %v3308_v27, %v2579_v26 }
  0xa1   :  { %1891 = vmatpush.bf16.msra.mxu2 %v2516_v38  ;;  %v2947_v30 = vld [vmem:[#allocation5 + $0x5e8] sm:$0xf]  ;;  %v3400_v32 = vld [vmem:[#allocation5 + $0x5f4] sm:$0xf0]  ;;  %v2820_v41 = vor.u32 %v3368_v29, %v2819_v28 }
  0xa2   :  { %1905 = vmatpush.bf16.msra.mxu3 %v2644_v45  ;;  %v3075_v33 = vld [vmem:[#allocation5 + $0x6e8] sm:$0xf]  ;;  %v3432_v34 = vld [vmem:[#allocation5 + $0x6f4] sm:$0xf0]  ;;  %v2948_v42 = vor.u32 %v3400_v32, %v2947_v30 }
  0xa3   :  { %1864 = vmatpush.bf16.msra.mxu0 %v2244_v52  ;;  %v3203_v37 = vld [vmem:[#allocation5 + $0x7e8] sm:$0xf]  ;;  %v3464_v38 = vld [vmem:[#allocation5 + $0x7f4] sm:$0xf0]  ;;  %v3076_v45 = vor.u32 %v3432_v34, %v3075_v33 }
  0xa4   :  { %1878 = vmatpush.bf16.msra.mxu1 %v2372_v53  ;;  %v2803_v46 = vld [vmem:[#allocation5 + $0x4c8] sm:$0xf]  ;;  %v3364_v48 = vld [vmem:[#allocation5 + $0x4d4] sm:$0xf0]  ;;  %v3204_v50 = vor.u32 %v3464_v38, %v3203_v37 }
  0xa5   :  { %1892 = vmatpush.bf16.msra.mxu2 %v2500_v54  ;;  %v2931_v49 = vld [vmem:[#allocation5 + $0x5c8] sm:$0xf]  ;;  %v3396_v51 = vld [vmem:[#allocation5 + $0x5d4] sm:$0xf0]  ;;  %v2804_v56 = vor.u32 %v3364_v48, %v2803_v46 }
  0xa6   :  { %1906 = vmatpush.bf16.msra.mxu3 %v2628_v59  ;;  %v3059_v52 = vld [vmem:[#allocation5 + $0x6c8] sm:$0xf]  ;;  %v3428_v53 = vld [vmem:[#allocation5 + $0x6d4] sm:$0xf0]  ;;  %v2932_v59 = vor.u32 %v3396_v51, %v2931_v49 }
  0xa7   :  { %1865 = vmatpush.bf16.msra.mxu0 %v2228_v2  ;;  %v3187_v54 = vld [vmem:[#allocation5 + $0x7c8] sm:$0xf]  ;;  %v3460_v55 = vld [vmem:[#allocation5 + $0x7d4] sm:$0xf0]  ;;  %v3060_v60 = vor.u32 %v3428_v53, %v3059_v52 }
  0xa8   :  { %1879 = vmatpush.bf16.msra.mxu1 %v2356_v3  ;;  %v2787_v57 = vld [vmem:[#allocation5 + $0x4a8] sm:$0xf]  ;;  %v3360_v61 = vld [vmem:[#allocation5 + $0x4b4] sm:$0xf0]  ;;  %v3188_v0 = vor.u32 %v3460_v55, %v3187_v54 }
  0xa9   :  { %1893 = vmatpush.bf16.msra.mxu2 %v2484_v4  ;;  %v2915_v62 = vld [vmem:[#allocation5 + $0x5a8] sm:$0xf]  ;;  %v3392_v2 = vld [vmem:[#allocation5 + $0x5b4] sm:$0xf0]  ;;  %v2788_v7 = vor.u32 %v3360_v61, %v2787_v57 }
  0xaa   :  { %1907 = vmatpush.bf16.msra.mxu3 %v2612_v8  ;;  %v3043_v3 = vld [vmem:[#allocation5 + $0x6a8] sm:$0xf]  ;;  %v3424_v4 = vld [vmem:[#allocation5 + $0x6b4] sm:$0xf0]  ;;  %v348_v8 = vperm.slane %v3634_v63, 0  ;;  %v2916_v9 = vor.u32 %v3392_v2, %v2915_v62 }
  0xab   :  { %1866 = vmatpush.bf16.msra.mxu0 %v2212_v15  ;;  %v3171_v5 = vld [vmem:[#allocation5 + $0x7a8] sm:$0xf]  ;;  %v3456_v6 = vld [vmem:[#allocation5 + $0x7b4] sm:$0xf0]  ;;  %v3044_v11 = vor.u32 %v3424_v4, %v3043_v3 }
  0xac   :  { %1880 = vmatpush.bf16.msra.mxu1 %v2340_v19  ;;  %v2771_v12 = vld [vmem:[#allocation5 + $0x488] sm:$0xf]  ;;  %v3356_v13 = vld [vmem:[#allocation5 + $0x494] sm:$0xf0]  ;;  %v3172_v15 = vor.u32 %v3456_v6, %v3171_v5 }
  0xad   :  { %1894 = vmatpush.bf16.msra.mxu2 %v2468_v20  ;;  %v2899_v14 = vld [vmem:[#allocation5 + $0x588] sm:$0xf]  ;;  %v3388_v16 = vld [vmem:[#allocation5 + $0x594] sm:$0xf0]  ;;  %v2772_v23 = vor.u32 %v3356_v13, %v2771_v12 }
  0xae   :  { %1908 = vmatpush.bf16.msra.mxu3 %v2596_v24  ;;  %v3027_v18 = vld [vmem:[#allocation5 + $0x688] sm:$0xf]  ;;  %v3420_v19 = vld [vmem:[#allocation5 + $0x694] sm:$0xf0]  ;;  %v2900_v25 = vor.u32 %v3388_v16, %v2899_v14 }
  0xaf   :  { %1867 = vmatpush.bf16.msra.mxu0 %v2196_v31  ;;  %v3155_v20 = vld [vmem:[#allocation5 + $0x788] sm:$0xf]  ;;  %v3452_v21 = vld [vmem:[#allocation5 + $0x794] sm:$0xf0]  ;;  %v3028_v26 = vor.u32 %v3420_v19, %v3027_v18 }
  0xb0   :  { %1881 = vmatpush.bf16.msra.mxu1 %v2324_v35  ;;  %v2755_v27 = vld [vmem:[#allocation5 + $0x468] sm:$0xf]  ;;  %v3352_v28 = vld [vmem:[#allocation5 + $0x474] sm:$0xf0]  ;;  %v3156_v30 = vor.u32 %v3452_v21, %v3155_v20 }
  0xb1   :  { %1895 = vmatpush.bf16.msra.mxu2 %v2452_v36  ;;  %v2883_v29 = vld [vmem:[#allocation5 + $0x568] sm:$0xf]  ;;  %v3384_v31 = vld [vmem:[#allocation5 + $0x574] sm:$0xf0]  ;;  %v1659_v36 = vpop.f32.mrf.mxu1  ;;  %v2756_v37 = vor.u32 %v3352_v28, %v2755_v27  ;;  %v3238_v28 = vld [vmem:[#allocation5 + $0xec] sm:$0xf] }
  0xb2   :  { %1909 = vmatpush.bf16.msra.mxu3 %v2580_v40  ;;  %1868 = vmatmul.bf16.vlgmr.msra.gmra.mxu0 %v3602_v58  ;;  %v3011_v32 = vld [vmem:[#allocation5 + $0x668] sm:$0xf]  ;;  %v3416_v33 = vld [vmem:[#allocation5 + $0x674] sm:$0xf0]  ;;  %v2884_v40 = vor.u32 %v3384_v31, %v2883_v29  ;;  %v2309_v29 = vld [vmem:[#allocation5 + $0xf8] sm:$0xf0] }
  0xb3   :  { %1916 = vmatpush.bf16.msrb.mxu0 %v2820_v41  ;;  %1882 = vmatmul.bf16.vlgmr.msra.gmra.mxu1 %v3608_v10  ;;  %v3139_v34 = vld [vmem:[#allocation5 + $0x768] sm:$0xf]  ;;  %v3448_v35 = vld [vmem:[#allocation5 + $0x774] sm:$0xf0]  ;;  %v3012_v41 = vor.u32 %v3416_v33, %v3011_v32  ;;  %v2437_v33 = vld [vmem:[#allocation5 + $0x1f8] sm:$0xf0] }
  0xb4   :  { %1930 = vmatpush.bf16.msrb.mxu1 %v2948_v42  ;;  %1896 = vmatmul.bf16.vlgmr.msra.gmra.mxu2 %v3604_v1  ;;  %v2739_v42 = vld [vmem:[#allocation5 + $0x448] sm:$0xf]  ;;  %v3140_v48 = vor.u32 %v3448_v35, %v3139_v34  ;;  %v3380_v49 = vld [vmem:[#allocation5 + $0x554] sm:$0xf0]  ;;  %v3302_v34 = vld [vmem:[#allocation5 + $0x2ec] sm:$0xf] }
  0xb5   :  { %1944 = vmatpush.bf16.msrb.mxu2 %v3076_v45  ;;  %1910 = vmatmul.bf16.vlgmr.msra.gmra.mxu3 %v3610_v17  ;;  %v3348_v45 = vld [vmem:[#allocation5 + $0x454] sm:$0xf0]  ;;  %v2867_v46 = vld [vmem:[#allocation5 + $0x548] sm:$0xf]  ;;  %v2565_v35 = vld [vmem:[#allocation5 + $0x2f8] sm:$0xf0] }
  0xb6   :  { %1958 = vmatpush.bf16.msrb.mxu3 %v3204_v50  ;;  %v2995_v50 = vld [vmem:[#allocation5 + $0x648] sm:$0xf]  ;;  %v3412_v51 = vld [vmem:[#allocation5 + $0x654] sm:$0xf0]  ;;  %v2740_v57 = vor.u32 %v3348_v45, %v2739_v42  ;;  %v2312_v42 = vor.u32 %v3238_v28, %v2309_v29 }
  0xb7   :  { %1917 = vmatpush.bf16.msrb.mxu0 %v2804_v56  ;;  %v1645_v22 = vpop.f32.mrf.mxu0  ;;  %v3123_v53 = vld [vmem:[#allocation5 + $0x748] sm:$0xf]  ;;  %v3444_v54 = vld [vmem:[#allocation5 + $0x754] sm:$0xf0]  ;;  %v2996_v61 = vor.u32 %v3412_v51, %v2995_v50  ;;  %v2293_v50 = vld [vmem:[#allocation5 + $0xd8] sm:$0xf0] }
  0xb8   :  { %1931 = vmatpush.bf16.msrb.mxu1 %v2932_v59  ;;  %v1646_v24 = vadd.f32 %v1645_v22, %v348_v8  ;;  %v2723_v62 = vld [vmem:[#allocation5 + $0x428] sm:$0xf]  ;;  %v3124_v3 = vor.u32 %v3444_v54, %v3123_v53  ;;  %v3376_v4 = vld [vmem:[#allocation5 + $0x534] sm:$0xf0]  ;;  %v3266_v51 = vld [vmem:[#allocation5 + $0x1cc] sm:$0xf] }
  0xb9   :  { %1945 = vmatpush.bf16.msrb.mxu2 %v3060_v60  ;;  %v2868_v60 = vor.u32 %v3380_v49, %v2867_v46  ;;  %v2851_v2 = vld [vmem:[#allocation5 + $0x528] sm:$0xf]  ;;  %v3408_v6 = vld [vmem:[#allocation5 + $0x634] sm:$0xf0]  ;;  %v1661_v13 = vpop.f32.mrf.mxu1  ;;  %v3234_v49 = vld [vmem:[#allocation5 + $0xcc] sm:$0xf] }
  0xba   :  { %1959 = vmatpush.bf16.msrb.mxu3 %v3188_v0  ;;  %v1660_v38 = vadd.f32 %v1659_v36, %v1646_v24  ;;  %v3344_v0 = vld [vmem:[#allocation5 + $0x434] sm:$0xf0]  ;;  %v2979_v5 = vld [vmem:[#allocation5 + $0x628] sm:$0xf]  ;;  %v2852_v18 = vor.u32 %v3376_v4, %v2851_v2  ;;  %v2421_v54 = vld [vmem:[#allocation5 + $0x1d8] sm:$0xf0] }
  0xbb   :  { %1918 = vmatpush.bf16.msrb.mxu0 %v2788_v7  ;;  %v1687_v7 = vpop.f32.mrf.mxu3  ;;  %v2707_v14 = vld [vmem:[#allocation5 + $0x408] sm:$0xf]  ;;  %v2980_v19 = vor.u32 %v3408_v6, %v2979_v5  ;;  %v3372_v21 = vld [vmem:[#allocation5 + $0x514] sm:$0xf0]  ;;  %v2277_v2 = vld [vmem:[#allocation5 + $0xb8] sm:$0xf0] }
  0xbc   :  { %1932 = vmatpush.bf16.msrb.mxu1 %v2916_v9  ;;  %v3107_v9 = vld [vmem:[#allocation5 + $0x728] sm:$0xf]  ;;  %v3404_v24 = vld [vmem:[#allocation5 + $0x614] sm:$0xf0]  ;;  %v2405_v5 = vld [vmem:[#allocation5 + $0x1b8] sm:$0xf0] }
  0xbd   :  { %1946 = vmatpush.bf16.msrb.mxu2 %v3044_v11  ;;  %v3440_v11 = vld [vmem:[#allocation5 + $0x734] sm:$0xf0]  ;;  %v2835_v20 = vld [vmem:[#allocation5 + $0x508] sm:$0xf]  ;;  %v3294_v6 = vld [vmem:[#allocation5 + $0x2ac] sm:$0xf] }
  0xbe   :  { %1960 = vmatpush.bf16.msrb.mxu3 %v3172_v15  ;;  %v1673_v52 = vpop.f32.mrf.mxu2  ;;  %v3340_v15 = vld [vmem:[#allocation5 + $0x414] sm:$0xf0]  ;;  %v2963_v22 = vld [vmem:[#allocation5 + $0x608] sm:$0xf]  ;;  %v2836_v36 = vor.u32 %v3372_v21, %v2835_v20  ;;  %v2389_v20 = vld [vmem:[#allocation5 + $0x198] sm:$0xf0] }
  0xbf   :  { %1919 = vmatpush.bf16.msrb.mxu0 %v2772_v23  ;;  %v1674_v55 = vadd.f32 %v1673_v52, %v1660_v38  ;;  %v1647_v56 = vpop.f32.mrf.mxu0  ;;  %v3108_v23 = vor.u32 %v3440_v11, %v3107_v9  ;;  %v2708_v32 = vor.u32 %v3340_v15, %v2707_v14  ;;  %v3334_v38 = vld [vmem:[#allocation5 + $0x3ec] sm:$0xf]  ;;  %v2661_v11 = vld [vmem:[#allocation5 + $0x3b8] sm:$0xf0] }
  0xc0   :  { %1933 = vmatpush.bf16.msrb.mxu1 %v2900_v25  ;;  %v1648_v59 = vadd.f32 %v1647_v56, %v348_v8  ;;  %v2724_v8 = vor.u32 %v3344_v0, %v2723_v62  ;;  %v3091_v25 = vld [vmem:[#allocation5 + $0x708] sm:$0xf]  ;;  %v2549_v56 = vld [vmem:[#allocation5 + $0x2d8] sm:$0xf0]  ;;  %v3230_v0 = vld [vmem:[#allocation5 + $0xac] sm:$0xf] }
  0xc1   :  { %1947 = vmatpush.bf16.msrb.mxu2 %v3028_v26  ;;  %v3641_v12 = vadd.f32 %v1687_v7, %v1674_v55  ;;  %v3436_v26 = vld [vmem:[#allocation5 + $0x714] sm:$0xf0]  ;;  %v3298_v55 = vld [vmem:[#allocation5 + $0x2cc] sm:$0xf]  ;;  %v2533_v7 = vld [vmem:[#allocation5 + $0x2b8] sm:$0xf0] }
  0xc2   :  { %1961 = vmatpush.bf16.msrb.mxu3 %v3156_v30  ;;  %v1662_v16 = vadd.f32 %v1661_v13, %v1648_v59  ;;  %v3270_v30 = vld [vmem:[#allocation5 + $0x1ec] sm:$0xf]  ;;  %v2677_v59 = vld [vmem:[#allocation5 + $0x3d8] sm:$0xf0]  ;;  %v2552_v62 = vor.u32 %v3298_v55, %v2549_v56  ;;  %v2280_v13 = vor.u32 %v3230_v0, %v2277_v2  ;;  %v2536_v14 = vor.u32 %v3294_v6, %v2533_v7 }
  0xc3   :  { %1920 = vmatpush.bf16.msrb.mxu0 %v2756_v37  ;;  %v2964_v37 = vor.u32 %v3404_v24, %v2963_v22  ;;  %v1689_v45 = vpop.f32.mrf.mxu3  ;;  %v2440_v46 = vor.u32 %v3270_v30, %v2437_v33  ;;  %v3326_v9 = vld [vmem:[#allocation5 + $0x3ac] sm:$0xf]  ;;  %v2517_v22 = vld [vmem:[#allocation5 + $0x298] sm:$0xf0] }
  0xc4   :  { %1934 = vmatpush.bf16.msrb.mxu1 %v2884_v40  ;;  %v2693_v40 = vld [vmem:[#allocation5 + $0x3f8] sm:$0xf0]  ;;  %v3226_v15 = vld [vmem:[#allocation5 + $0x8c] sm:$0xf] }
  0xc5   :  { %1948 = vmatpush.bf16.msrb.mxu2 %v3012_v41  ;;  %v3092_v41 = vor.u32 %v3436_v26, %v3091_v25  ;;  %v2696_v53 = vor.u32 %v3334_v38, %v2693_v40  ;;  %v3290_v21 = vld [vmem:[#allocation5 + $0x28c] sm:$0xf]  ;;  %v2645_v25 = vld [vmem:[#allocation5 + $0x398] sm:$0xf0] }
  0xc6   :  { %1962 = vmatpush.bf16.msrb.mxu3 %v3140_v48  ;;  %v1675_v27 = vpop.f32.mrf.mxu2  ;;  %v2568_v48 = vor.u32 %v3302_v34, %v2565_v35  ;;  %v3322_v24 = vld [vmem:[#allocation5 + $0x38c] sm:$0xf]  ;;  %v2520_v30 = vor.u32 %v3290_v21, %v2517_v22  ;;  %v2501_v38 = vld [vmem:[#allocation5 + $0x278] sm:$0xf0] }
  0xc7   :  { %1921 = vmatpush.bf16.msrb.mxu0 %v2740_v57  ;;  %v1676_v31 = vadd.f32 %v1675_v27, %v1662_v16  ;;  %v3330_v57 = vld [vmem:[#allocation5 + $0x3cc] sm:$0xf]  ;;  %v2261_v16 = vld [vmem:[#allocation5 + $0x98] sm:$0xf0]  ;;  %v2648_v34 = vor.u32 %v3322_v24, %v2645_v25 }
  0xc8   :  { %1935 = vmatpush.bf16.msrb.mxu1 %v2868_v60  ;;  %v2296_v60 = vor.u32 %v3234_v49, %v2293_v50  ;;  %v2680_v4 = vor.u32 %v3330_v57, %v2677_v59  ;;  %v2264_v27 = vor.u32 %v3226_v15, %v2261_v16  ;;  %v3254_v33 = vld [vmem:[#allocation5 + $0x16c] sm:$0xf]  ;;  %v2485_v55 = vld [vmem:[#allocation5 + $0x258] sm:$0xf0] }
  0xc9   :  { %1949 = vmatpush.bf16.msrb.mxu2 %v2996_v61  ;;  %v3643_v52 = vadd.f32 %v1689_v45, %v1676_v31  ;;  %v2424_v61 = vor.u32 %v3266_v51, %v2421_v54  ;;  %v3222_v31 = vld [vmem:[#allocation5 + $0x6c] sm:$0xf]  ;;  %v2213_v7 = vld [vmem:[#allocation5 + $0x38] sm:$0xf0] }
  0xca   :  { %1963 = vmatpush.bf16.msrb.mxu3 %v3124_v3  ;;  %v3262_v3 = vld [vmem:[#allocation5 + $0x1ac] sm:$0xf]  ;;  %v2469_v15 = vld [vmem:[#allocation5 + $0x238] sm:$0xf0] }
  0xcb   :  { %1922 = vmatpush.bf16.msrb.mxu0 %v2724_v8  ;;  %v2408_v8 = vor.u32 %v3262_v3, %v2405_v5  ;;  %v3318_v40 = vld [vmem:[#allocation5 + $0x36c] sm:$0xf]  ;;  %v2325_v24 = vld [vmem:[#allocation5 + $0x118] sm:$0xf0] }
  0xcc   :  { %1936 = vmatpush.bf16.msrb.mxu1 %v2852_v18  ;;  %v3258_v18 = vld [vmem:[#allocation5 + $0x18c] sm:$0xf] }
  0xcd   :  { %1950 = vmatpush.bf16.msrb.mxu2 %v2980_v19  ;;  %v2664_v19 = vor.u32 %v3326_v9, %v2661_v11  ;;  %v2392_v29 = vor.u32 %v3258_v18, %v2389_v20  ;;  %v3250_v49 = vld [vmem:[#allocation5 + $0x14c] sm:$0xf]  ;;  %v2597_v18 = vld [vmem:[#allocation5 + $0x338] sm:$0xf0] }
  0xce   :  { %1964 = vmatpush.bf16.msrb.mxu3 %v3108_v23  ;;  %v3282_v54 = vld [vmem:[#allocation5 + $0x24c] sm:$0xf]  ;;  %v2197_v20 = vld [vmem:[#allocation5 + $0x18] sm:$0xf0] }
  0xcf   :  { %1923 = vmatpush.bf16.msrb.mxu0 %v2708_v32  ;;  %v2245_v32 = vld [vmem:[#allocation5 + $0x78] sm:$0xf0]  ;;  %v2488_v5 = vor.u32 %v3282_v54, %v2485_v55  ;;  %v3214_v6 = vld [vmem:[#allocation5 + $0x2c] sm:$0xf] }
  0xd0   :  { %1937 = vmatpush.bf16.msrb.mxu1 %v2836_v36  ;;  %v1715_v28 = vpop.f32.mrf.mxu1  ;;  %v2373_v36 = vld [vmem:[#allocation5 + $0x178] sm:$0xf0]  ;;  %v3246_v9 = vld [vmem:[#allocation5 + $0x12c] sm:$0xf] }
  0xd1   :  { %1951 = vmatpush.bf16.msrb.mxu2 %v2964_v37  ;;  %v1701_v23 = vpop.f32.mrf.mxu0  ;;  %v3286_v37 = vld [vmem:[#allocation5 + $0x26c] sm:$0xf]  ;;  %v2805_v54 = vld [vmem:[#allocation5 + $0x4d8] sm:$0xf0] }
  0xd2   :  { %1965 = vmatpush.bf16.msrb.mxu3 %v3092_v41  ;;  %1924 = vmatmul.bf16.vlgmr.msrb.gmra.mxu0 %v3614_v39  ;;  %v1702_v26 = vadd.f32 %v1701_v23, %v3641_v12  ;;  %v2629_v41 = vld [vmem:[#allocation5 + $0x378] sm:$0xf0]  ;;  %v2376_v12 = vor.u32 %v3254_v33, %v2373_v36  ;;  %v2504_v45 = vor.u32 %v3286_v37, %v2501_v38  ;;  %v3310_v16 = vld [vmem:[#allocation5 + $0x32c] sm:$0xf] }
  0xd3   :  { %1972 = vmatpush.bf16.msra.mxu0 %v2312_v42  ;;  %1938 = vmatmul.bf16.vlgmr.msrb.gmra.mxu1 %v3618_v44  ;;  %v2248_v42 = vor.u32 %v3222_v31, %v2245_v32  ;;  %v2632_v50 = vor.u32 %v3318_v40, %v2629_v41  ;;  %v3242_v23 = vld [vmem:[#allocation5 + $0x10c] sm:$0xf]  ;;  %v2949_v37 = vld [vmem:[#allocation5 + $0x5f8] sm:$0xf0] }
  0xd4   :  { %1986 = vmatpush.bf16.msra.mxu1 %v2440_v46  ;;  %1952 = vmatmul.bf16.vlgmr.msrb.gmra.mxu2 %v3616_v43  ;;  %v1716_v35 = vadd.f32 %v1715_v28, %v1702_v26  ;;  %v3218_v46 = vld [vmem:[#allocation5 + $0x4c] sm:$0xf]  ;;  %v2600_v26 = vor.u32 %v3310_v16, %v2597_v18  ;;  %v2453_v28 = vld [vmem:[#allocation5 + $0x218] sm:$0xf0]  ;;  %v349_v18 = vperm.slane %v3634_v63, 1 }
  0xd5   :  { %2000 = vmatpush.bf16.msra.mxu2 %v2568_v48  ;;  %1966 = vmatmul.bf16.vlgmr.msrb.gmra.mxu3 %v3620_v47  ;;  %v2229_v48 = vld [vmem:[#allocation5 + $0x58] sm:$0xf0]  ;;  %v3274_v25 = vld [vmem:[#allocation5 + $0x20c] sm:$0xf] }
  0xd6   :  { %2014 = vmatpush.bf16.msra.mxu3 %v2696_v53  ;;  %v2357_v53 = vld [vmem:[#allocation5 + $0x158] sm:$0xf0]  ;;  %v2232_v0 = vor.u32 %v3218_v46, %v2229_v48  ;;  %v3366_v33 = vld [vmem:[#allocation5 + $0x4ec] sm:$0xf] }
  0xd7   :  { %1973 = vmatpush.bf16.msra.mxu0 %v2296_v60  ;;  %v3314_v60 = vld [vmem:[#allocation5 + $0x34c] sm:$0xf]  ;;  %v3077_v40 = vld [vmem:[#allocation5 + $0x6f8] sm:$0xf0] }
  0xd8   :  { %1987 = vmatpush.bf16.msra.mxu1 %v2424_v61  ;;  %v1743_v59 = vpop.f32.mrf.mxu3  ;;  %v2613_v61 = vld [vmem:[#allocation5 + $0x358] sm:$0xf0]  ;;  %v1717_v2 = vpop.f32.mrf.mxu1  ;;  %v3430_v38 = vld [vmem:[#allocation5 + $0x6ec] sm:$0xf] }
  0xd9   :  { %2001 = vmatpush.bf16.msra.mxu2 %v2552_v62  ;;  %v1729_v51 = vpop.f32.mrf.mxu2  ;;  %v1703_v57 = vpop.f32.mrf.mxu0  ;;  %v2616_v11 = vor.u32 %v3314_v60, %v2613_v61  ;;  %v3205_v46 = vld [vmem:[#allocation5 + $0x7f8] sm:$0xf0]  ;;  %v3394_v55 = vld [vmem:[#allocation5 + $0x5cc] sm:$0xf] }
  0xda   :  { %2015 = vmatpush.bf16.msra.mxu3 %v2680_v4  ;;  %v1730_v56 = vadd.f32 %v1729_v51, %v1716_v35  ;;  %v1704_v62 = vadd.f32 %v1703_v57, %v3643_v52  ;;  %v2360_v4 = vor.u32 %v3250_v49, %v2357_v53  ;;  %v2216_v52 = vor.u32 %v3214_v6, %v2213_v7  ;;  %v3398_v35 = vld [vmem:[#allocation5 + $0x5ec] sm:$0xf]  ;;  %v2933_v57 = vld [vmem:[#allocation5 + $0x5d8] sm:$0xf0] }
  0xdb   :  { %1974 = vmatpush.bf16.msra.mxu0 %v2280_v13  ;;  %v3080_v51 = vor.u32 %v3430_v38, %v3077_v40  ;;  %v3362_v53 = vld [vmem:[#allocation5 + $0x4cc] sm:$0xf]  ;;  %v3061_v60 = vld [vmem:[#allocation5 + $0x6d8] sm:$0xf0] }
  0xdc   :  { %1988 = vmatpush.bf16.msra.mxu1 %v2408_v8  ;;  %v3651_v3 = vadd.f32 %v1743_v59, %v1730_v56  ;;  %v1718_v13 = vadd.f32 %v1717_v2, %v1704_v62  ;;  %v2341_v8 = vld [vmem:[#allocation5 + $0x138] sm:$0xf0]  ;;  %v3426_v59 = vld [vmem:[#allocation5 + $0x6cc] sm:$0xf]  ;;  %v2936_v2 = vor.u32 %v3394_v55, %v2933_v57 }
  0xdd   :  { %2002 = vmatpush.bf16.msra.mxu2 %v2536_v14  ;;  %v3278_v14 = vld [vmem:[#allocation5 + $0x22c] sm:$0xf]  ;;  %v2344_v21 = vor.u32 %v3246_v9, %v2341_v8  ;;  %v3189_v62 = vld [vmem:[#allocation5 + $0x7d8] sm:$0xf0] }
  0xde   :  { %2016 = vmatpush.bf16.msra.mxu3 %v2664_v19  ;;  %v3210_v19 = vld [vmem:[#allocation5 + $0xc] sm:$0xf]  ;;  %v2472_v22 = vor.u32 %v3278_v14, %v2469_v15  ;;  %v2789_v6 = vld [vmem:[#allocation5 + $0x4b8] sm:$0xf0]  ;;  %vm2084_vm0 = vcmp.gt.f32.partialorder %v3651_v3, 0.0 }
  0xdf   :  { %1975 = vmatpush.bf16.msra.mxu0 %v2264_v27  ;;  %v2200_v36 = vor.u32 %v3210_v19, %v2197_v20  ;;  %v3458_v61 = vld [vmem:[#allocation5 + $0x7cc] sm:$0xf]  ;;  %v3045_v8 = vld [vmem:[#allocation5 + $0x6b8] sm:$0xf0] }
  0xe0   :  { %1989 = vmatpush.bf16.msra.mxu1 %v2392_v29  ;;  %v3306_v29 = vld [vmem:[#allocation5 + $0x30c] sm:$0xf]  ;;  %v1745_v32 = vpop.f32.mrf.mxu3  ;;  %v3192_v9 = vor.u32 %v3458_v61, %v3189_v62  ;;  %v3173_v15 = vld [vmem:[#allocation5 + $0x7b8] sm:$0xf0] }
  0xe1   :  { %2003 = vmatpush.bf16.msra.mxu2 %v2520_v30  ;;  %v1731_v27 = vpop.f32.mrf.mxu2  ;;  %v2581_v30 = vld [vmem:[#allocation5 + $0x318] sm:$0xf0]  ;;  %v3390_v7 = vld [vmem:[#allocation5 + $0x5ac] sm:$0xf] }
  0xe2   :  { %2017 = vmatpush.bf16.msra.mxu3 %v2648_v34  ;;  %v1732_v31 = vadd.f32 %v1731_v27, %v1718_v13  ;;  %v2821_v34 = vld [vmem:[#allocation5 + $0x4f8] sm:$0xf0]  ;;  %v2584_v48 = vor.u32 %v3306_v29, %v2581_v30  ;;  %v3422_v13 = vld [vmem:[#allocation5 + $0x6ac] sm:$0xf] }
  0xe3   :  { %1976 = vmatpush.bf16.msra.mxu0 %v2248_v42  ;;  %v2328_v42 = vor.u32 %v3242_v23, %v2325_v24  ;;  %v2824_v49 = vor.u32 %v3366_v33, %v2821_v34  ;;  %v3454_v14 = vld [vmem:[#allocation5 + $0x7ac] sm:$0xf]  ;;  %v3048_v19 = vor.u32 %v3422_v13, %v3045_v8  ;;  %v2773_v20 = vld [vmem:[#allocation5 + $0x498] sm:$0xf0] }
  0xe4   :  { %1990 = vmatpush.bf16.msra.mxu1 %v2376_v12  ;;  %v3653_v41 = vadd.f32 %v1745_v32, %v1732_v31  ;;  %v2456_v12 = vor.u32 %v3274_v25, %v2453_v28  ;;  %v2901_v23 = vld [vmem:[#allocation5 + $0x598] sm:$0xf0]  ;;  %v3418_v24 = vld [vmem:[#allocation5 + $0x68c] sm:$0xf] }
  0xe5   :  { %2004 = vmatpush.bf16.msra.mxu2 %v2504_v45  ;;  %v3462_v45 = vld [vmem:[#allocation5 + $0x7ec] sm:$0xf]  ;;  %v2757_v32 = vld [vmem:[#allocation5 + $0x478] sm:$0xf0] }
  0xe6   :  { %2018 = vmatpush.bf16.msra.mxu3 %v2632_v50  ;;  %v2952_v50 = vor.u32 %v3398_v35, %v2949_v37  ;;  %v3208_v56 = vor.u32 %v3462_v45, %v3205_v46  ;;  %v3450_v25 = vld [vmem:[#allocation5 + $0x78c] sm:$0xf]  ;;  %v2885_v35 = vld [vmem:[#allocation5 + $0x578] sm:$0xf0]  ;;  %vm2088_vm2 = vcmp.gt.f32.partialorder %v3653_v41, 0.0 }
  0xe7   :  { %1977 = vmatpush.bf16.msra.mxu0 %v2232_v0  ;;  %v2808_v0 = vor.u32 %v3362_v53, %v2805_v54  ;;  %v3350_v31 = vld [vmem:[#allocation5 + $0x46c] sm:$0xf]  ;;  %v3013_v37 = vld [vmem:[#allocation5 + $0x678] sm:$0xf0] }
  0xe8   :  { %1991 = vmatpush.bf16.msra.mxu1 %v2360_v4  ;;  %v3064_v4 = vor.u32 %v3426_v59, %v3061_v60  ;;  %v3382_v33 = vld [vmem:[#allocation5 + $0x56c] sm:$0xf]  ;;  %v2869_v53 = vld [vmem:[#allocation5 + $0x558] sm:$0xf0] }
  0xe9   :  { %2005 = vmatpush.bf16.msra.mxu2 %v2488_v5  ;;  %v3358_v5 = vld [vmem:[#allocation5 + $0x4ac] sm:$0xf]  ;;  %v2888_v45 = vor.u32 %v3382_v33, %v2885_v35  ;;  %v2997_v55 = vld [vmem:[#allocation5 + $0x658] sm:$0xf0] }
  0xea   :  { %2019 = vmatpush.bf16.msra.mxu3 %v2616_v11  ;;  %v2917_v11 = vld [vmem:[#allocation5 + $0x5b8] sm:$0xf0]  ;;  %v2792_v16 = vor.u32 %v3358_v5, %v2789_v6  ;;  %v3446_v40 = vld [vmem:[#allocation5 + $0x76c] sm:$0xf] }
  0xeb   :  { %1978 = vmatpush.bf16.msra.mxu0 %v2216_v52  ;;  %v2920_v52 = vor.u32 %v3390_v7, %v2917_v11  ;;  %v3410_v54 = vld [vmem:[#allocation5 + $0x64c] sm:$0xf]  ;;  %v3125_v59 = vld [vmem:[#allocation5 + $0x758] sm:$0xf0] }
  0xec   :  { %1992 = vmatpush.bf16.msra.mxu1 %v2344_v21  ;;  %v3386_v21 = vld [vmem:[#allocation5 + $0x58c] sm:$0xf]  ;;  %v3000_v5 = vor.u32 %v3410_v54, %v2997_v55  ;;  %v2725_v7 = vld [vmem:[#allocation5 + $0x438] sm:$0xf0] }
  0xed   :  { %2006 = vmatpush.bf16.msra.mxu2 %v2472_v22  ;;  %v3176_v22 = vor.u32 %v3454_v14, %v3173_v15  ;;  %v2904_v29 = vor.u32 %v3386_v21, %v2901_v23  ;;  %v3442_v57 = vld [vmem:[#allocation5 + $0x74c] sm:$0xf]  ;;  %v2853_v14 = vld [vmem:[#allocation5 + $0x538] sm:$0xf0] }
  0xee   :  { %2020 = vmatpush.bf16.msra.mxu3 %v2600_v26  ;;  %v3342_v6 = vld [vmem:[#allocation5 + $0x42c] sm:$0xf]  ;;  %v3128_v8 = vor.u32 %v3442_v57, %v3125_v59  ;;  %v2709_v23 = vld [vmem:[#allocation5 + $0x418] sm:$0xf0] }
  0xef   :  { %1979 = vmatpush.bf16.msra.mxu0 %v2200_v36  ;;  %v1757_v26 = vpop.f32.mrf.mxu0  ;;  %v3414_v36 = vld [vmem:[#allocation5 + $0x66c] sm:$0xf] }
  0xf0   :  { %1993 = vmatpush.bf16.msra.mxu1 %v2328_v42  ;;  %v1771_v28 = vpop.f32.mrf.mxu1  ;;  %v3141_v42 = vld [vmem:[#allocation5 + $0x778] sm:$0xf0]  ;;  %v3016_v46 = vor.u32 %v3414_v36, %v3013_v37  ;;  %v3406_v15 = vld [vmem:[#allocation5 + $0x62c] sm:$0xf] }
  0xf1   :  { %2007 = vmatpush.bf16.msra.mxu2 %v2456_v12  ;;  %v2760_v12 = vor.u32 %v3350_v31, %v2757_v32 }
  0xf2   :  { %2021 = vmatpush.bf16.msra.mxu3 %v2584_v48  ;;  %1980 = vmatmul.bf16.vlgmr.msra.gmra.mxu0 %v3602_v58  ;;  %v3029_v58 = vld [vmem:[#allocation5 + $0x698] sm:$0xf0]  ;;  %v3346_v48 = vld [vmem:[#allocation5 + $0x44c] sm:$0xf] }
  0xf3   :  { %2028 = vmatpush.bf16.msrb.mxu0 %v2824_v49  ;;  %1994 = vmatmul.bf16.vlgmr.msra.gmra.mxu1 %v3608_v10  ;;  %v1758_v10 = vadd.f32 %v1757_v26, %v349_v18  ;;  %v3032_v30 = vor.u32 %v3418_v24, %v3029_v58  ;;  %v2741_v49 = vld [vmem:[#allocation5 + $0x458] sm:$0xf0]  ;;  %v3370_v24 = vld [vmem:[#allocation5 + $0x50c] sm:$0xf] }
  0xf4   :  { %2042 = vmatpush.bf16.msrb.mxu1 %v2952_v50  ;;  %2008 = vmatmul.bf16.vlgmr.msra.gmra.mxu2 %v3604_v1  ;;  %v3354_v1 = vld [vmem:[#allocation5 + $0x48c] sm:$0xf]  ;;  %v2965_v26 = vld [vmem:[#allocation5 + $0x618] sm:$0xf0] }
  0xf5   :  { %2056 = vmatpush.bf16.msrb.mxu2 %v3080_v51  ;;  %2022 = vmatmul.bf16.vlgmr.msra.gmra.mxu3 %v3610_v17  ;;  %v3157_v17 = vld [vmem:[#allocation5 + $0x798] sm:$0xf0]  ;;  %v2776_v27 = vor.u32 %v3354_v1, %v2773_v20  ;;  %v1772_v38 = vadd.f32 %v1771_v28, %v1758_v10  ;;  %v3378_v50 = vld [vmem:[#allocation5 + $0x54c] sm:$0xf]  ;;  %v3144_v51 = vor.u32 %v3446_v40, %v3141_v42 }
  0xf6   :  { %2070 = vmatpush.bf16.msrb.mxu3 %v3208_v56  ;;  %v3160_v34 = vor.u32 %v3450_v25, %v3157_v17  ;;  %v3109_v1 = vld [vmem:[#allocation5 + $0x738] sm:$0xf0]  ;;  %v2728_v20 = vor.u32 %v3342_v6, %v2725_v7  ;;  %v3402_v17 = vld [vmem:[#allocation5 + $0x60c] sm:$0xf] }
  0xf7   :  { %2029 = vmatpush.bf16.msrb.mxu0 %v2808_v0  ;;  %v1785_v56 = vpop.f32.mrf.mxu2  ;;  %v1759_v61 = vpop.f32.mrf.mxu0  ;;  %v2744_v0 = vor.u32 %v3346_v48, %v2741_v49  ;;  %v2837_v25 = vld [vmem:[#allocation5 + $0x518] sm:$0xf0]  ;;  %v3434_v10 = vld [vmem:[#allocation5 + $0x70c] sm:$0xf]  ;;  %v2968_v33 = vor.u32 %v3402_v17, %v2965_v26 }
  0xf8   :  { %2043 = vmatpush.bf16.msrb.mxu1 %v2936_v2  ;;  %v1786_v60 = vadd.f32 %v1785_v56, %v1772_v38  ;;  %v1799_v62 = vpop.f32.mrf.mxu3  ;;  %v1760_v2 = vadd.f32 %v1759_v61, %v349_v18  ;;  %v1773_v13 = vpop.f32.mrf.mxu1  ;;  %v3093_v28 = vld [vmem:[#allocation5 + $0x718] sm:$0xf0]  ;;  %v2840_v32 = vor.u32 %v3370_v24, %v2837_v25 }
  0xf9   :  { %2057 = vmatpush.bf16.msrb.mxu2 %v3064_v4  ;;  %v2872_v4 = vor.u32 %v3378_v50, %v2869_v53  ;;  %v3096_v35 = vor.u32 %v3434_v10, %v3093_v28 }
  0xfa   :  { %2071 = vmatpush.bf16.msrb.mxu3 %v3192_v9  ;;  %v3374_v9 = vld [vmem:[#allocation5 + $0x52c] sm:$0xf]  ;;  %v1800_v11 = vadd.f32 %v1799_v62, %v1786_v60  ;;  %v2096_v60 = vmul.f32 0.2, %v3653_v41 }
  0xfb   :  { %2030 = vmatpush.bf16.msrb.mxu0 %v2792_v16  ;;  %v2981_v16 = vld [vmem:[#allocation5 + $0x638] sm:$0xf0]  ;;  %v2856_v18 = vor.u32 %v3374_v9, %v2853_v14 }
  0xfc   :  { %2044 = vmatpush.bf16.msrb.mxu1 %v2920_v52  ;;  %v1774_v52 = vadd.f32 %v1773_v13, %v1760_v2  ;;  %v2984_v21 = vor.u32 %v3406_v15, %v2981_v16 }
  0xfd   :  { %2058 = vmatpush.bf16.msrb.mxu2 %v3048_v19  ;;  %v3438_v19 = vld [vmem:[#allocation5 + $0x72c] sm:$0xf] }
  0xfe   :  { %2072 = vmatpush.bf16.msrb.mxu3 %v3176_v22  ;;  %v3338_v22 = vld [vmem:[#allocation5 + $0x40c] sm:$0xf]  ;;  %v3112_v58 = vor.u32 %v3438_v19, %v3109_v1 }
  0xff   :  { %2031 = vmatpush.bf16.msrb.mxu0 %v2776_v27  ;;  %v1787_v27 = vpop.f32.mrf.mxu2 }
 0x100   :  { %2045 = vmatpush.bf16.msrb.mxu1 %v2904_v29  ;;  %v1788_v29 = vadd.f32 %v1787_v27, %v1774_v52  ;;  %v1801_v31 = vpop.f32.mrf.mxu3 }
 0x101   :  { %2059 = vmatpush.bf16.msrb.mxu2 %v3032_v30  ;;  %v2712_v30 = vor.u32 %v3338_v22, %v2709_v23 }
 0x102   :  { %2073 = vmatpush.bf16.msrb.mxu3 %v3160_v34  ;;  %v1802_v34 = vadd.f32 %v1801_v31, %v1788_v29  ;;  %v351_v29 = vperm.slane %v3634_v63, 3 }
 0x103   :  { %2032 = vmatpush.bf16.msrb.mxu0 %v2760_v12  ;;  %v2092_v12 = vmul.f32 0.2, %v3651_v3 }
 0x104   :  { %2046 = vmatpush.bf16.msrb.mxu1 %v2888_v45  ;;  %v3668_v45 = vld [vmem:[%s3701_s3] sm:$0xf] }
 0x105   :  { %2060 = vmatpush.bf16.msrb.mxu2 %v3016_v46  ;;  %v2111_v50 = vperm.slane %v3668_v45, 1 }
 0x106   :  { %2074 = vmatpush.bf16.msrb.mxu3 %v3144_v51  ;;  %v2100_v51 = vsel %vm2084_vm0, %v3651_v3, %v2092_v12 }
 0x107   :  { %2033 = vmatpush.bf16.msrb.mxu0 %v2744_v0 }
 0x108   :  { %2047 = vmatpush.bf16.msrb.mxu1 %v2872_v4  ;;  %v2104_v4 = vsel %vm2088_vm2, %v3653_v41, %v2096_v60 }
 0x109   :  { %2061 = vmatpush.bf16.msrb.mxu2 %v3000_v5 }
 0x10a   :  { %2075 = vmatpush.bf16.msrb.mxu3 %v3128_v8 }
 0x10b   :  { %2034 = vmatpush.bf16.msrb.mxu0 %v2728_v20 }
 0x10c   :  { %2048 = vmatpush.bf16.msrb.mxu1 %v2856_v18  ;;  %v350_v18 = vperm.slane %v3634_v63, 2 }
 0x10d   :  { %2062 = vmatpush.bf16.msrb.mxu2 %v2984_v21 }
 0x10e   :  { %2076 = vmatpush.bf16.msrb.mxu3 %v3112_v58 }
 0x10f   :  { %2035 = vmatpush.bf16.msrb.mxu0 %v2712_v30  ;;  %v1813_v36 = vpop.f32.mrf.mxu0 }
 0x110   :  { %2049 = vmatpush.bf16.msrb.mxu1 %v2840_v32  ;;  %v1814_v37 = vadd.f32 %v1813_v36, %v1800_v11  ;;  %v1827_v38 = vpop.f32.mrf.mxu1 }
 0x111   :  { %2063 = vmatpush.bf16.msrb.mxu2 %v2968_v33 }
 0x112   :  { %2077 = vmatpush.bf16.msrb.mxu3 %v3096_v35  ;;  %2036 = vmatmul.bf16.vlgmr.msrb.gmra.mxu0 %v3614_v39  ;;  %v1828_v40 = vadd.f32 %v1827_v38, %v1814_v37 }
 0x113   :  { %2050 = vmatmul.bf16.vlgmr.msrb.gmra.mxu1 %v3618_v44 }
 0x114   :  { %2064 = vmatmul.bf16.vlgmr.msrb.gmra.mxu2 %v3616_v43 }
 0x115   :  { %2078 = vmatmul.bf16.vlgmr.msrb.gmra.mxu3 %v3620_v47  ;;  %v2110_v47 = vperm.slane %v3668_v45, 0 }
 0x117   :  { %v1841_v42 = vpop.f32.mrf.mxu2  ;;  %v1815_v39 = vpop.f32.mrf.mxu0  ;;  %v2118_v57 = vmul.f32 %v2110_v47, %v2100_v51  ;;  %v2122_v6 = vmul.f32 %v2110_v47, %v2104_v4 }
 0x118   :  { %v1842_v46 = vadd.f32 %v1841_v42, %v1828_v40  ;;  %v1855_v48 = vpop.f32.mrf.mxu3  ;;  %v1816_v43 = vadd.f32 %v1815_v39, %v1802_v34  ;;  %v1829_v49 = vpop.f32.mrf.mxu1 }
 0x11a   :  { %v1856_v44 = vadd.f32 %v1855_v48, %v1842_v46  ;;  %v1830_v55 = vadd.f32 %v1829_v49, %v1816_v43 }
 0x11c   :  { %vm2085_vm1 = vcmp.gt.f32.partialorder %v1856_v44, 0.0  ;;  %v2093_v53 = vmul.f32 0.2, %v1856_v44 }
 0x11e   :  { %v2101_v54 = vsel %vm2085_vm1, %v1856_v44, %v2093_v53 }
 0x11f   :  { %v1843_v56 = vpop.f32.mrf.mxu2  ;;  %v2119_v59 = vmul.f32 %v2111_v50, %v2101_v54 }
 0x120   :  { %v1844_v61 = vadd.f32 %v1843_v56, %v1830_v55  ;;  %v1857_v62 = vpop.f32.mrf.mxu3 }
 0x121   :  { %v3676_v0 = vadd.f32 %v2119_v59, %v2118_v57 }
 0x122   :  { %v1858_v2 = vadd.f32 %v1857_v62, %v1844_v61  ;;  %v2112_v62 = vperm.slane %v3668_v45, 2 }
 0x124   :  { %vm2089_vm3 = vcmp.gt.f32.partialorder %v1858_v2, 0.0  ;;  %v2097_v3 = vmul.f32 0.2, %v1858_v2 }
 0x126   :  { %v2105_v5 = vsel %vm2089_vm3, %v1858_v2, %v2097_v3 }
 0x127   :  { %v2123_v7 = vmul.f32 %v2111_v50, %v2105_v5 }
 0x129   :  { %v3679_v9 = vadd.f32 %v2123_v7, %v2122_v6 }
 0x12f   :  { %v1869_v11 = vpop.f32.mrf.mxu0 }
 0x130   :  { %v1883_v13 = vpop.f32.mrf.mxu1  ;;  %v1870_v21 = vadd.f32 %v1869_v11, %v350_v18 }
 0x132   :  { %v1884_v24 = vadd.f32 %v1883_v13, %v1870_v21 }
 0x137   :  { %v1897_v8 = vpop.f32.mrf.mxu2  ;;  %v1871_v15 = vpop.f32.mrf.mxu0 }
 0x138   :  { %v1911_v14 = vpop.f32.mrf.mxu3  ;;  %v1885_v16 = vpop.f32.mrf.mxu1  ;;  %v1898_v25 = vadd.f32 %v1897_v8, %v1884_v24  ;;  %v1872_v26 = vadd.f32 %v1871_v15, %v350_v18  ;;  %v2113_v8 = vperm.slane %v3668_v45, 3 }
 0x13a   :  { %v1912_v28 = vadd.f32 %v1911_v14, %v1898_v25  ;;  %v1886_v31 = vadd.f32 %v1885_v16, %v1872_v26 }
 0x13f   :  { %v1899_v52 = vpop.f32.mrf.mxu2 }
 0x140   :  { %v1913_v19 = vpop.f32.mrf.mxu3  ;;  %v1900_v35 = vadd.f32 %v1899_v52, %v1886_v31 }
 0x142   :  { %v1914_v42 = vadd.f32 %v1913_v19, %v1900_v35 }
 0x14f   :  { %v1925_v1 = vpop.f32.mrf.mxu0 }
 0x150   :  { %v1939_v20 = vpop.f32.mrf.mxu1  ;;  %v1926_v32 = vadd.f32 %v1925_v1, %v1912_v28  ;;  %v2137_v28 = vstv %s3702_s4 }
 0x152   :  { %v1940_v37 = vadd.f32 %v1939_v20, %v1926_v32 }
 0x157   :  { %v1953_v41 = vpop.f32.mrf.mxu2  ;;  %v1927_v23 = vpop.f32.mrf.mxu0 }
 0x158   :  { %v1967_v22 = vpop.f32.mrf.mxu3  ;;  %v1941_v58 = vpop.f32.mrf.mxu1  ;;  %v1954_v46 = vadd.f32 %v1953_v41, %v1940_v37  ;;  %v1928_v43 = vadd.f32 %v1927_v23, %v1914_v42 }
 0x15a   :  { %v1968_v47 = vadd.f32 %v1967_v22, %v1954_v46  ;;  %v1942_v53 = vadd.f32 %v1941_v58, %v1928_v43 }
 0x15c   :  { %v2094_v56 = vmul.f32 0.2, %v1968_v47  ;;  %vm2086_vm4 = vcmp.gt.f32.partialorder %v1968_v47, 0.0 }
 0x15e   :  { %v2102_v7 = vsel %vm2086_vm4, %v1968_v47, %v2094_v56 }
 0x15f   :  { %v1955_v17 = vpop.f32.mrf.mxu2  ;;  %v2120_v14 = vmul.f32 %v2112_v62, %v2102_v7 }
 0x160   :  { %v1969_v27 = vpop.f32.mrf.mxu3  ;;  %v1956_v57 = vadd.f32 %v1955_v17, %v1942_v53 }
 0x161   :  { %v2127_v41 = vadd.f32 %v3676_v0, %v2120_v14 }
 0x162   :  { %v1970_v2 = vadd.f32 %v1969_v27, %v1956_v57 }
 0x164   :  { %v2098_v15 = vmul.f32 0.2, %v1970_v2  ;;  %vm2090_vm6 = vcmp.gt.f32.partialorder %v1970_v2, 0.0 }
 0x166   :  { %v2106_v21 = vsel %vm2090_vm6, %v1970_v2, %v2098_v15 }
 0x167   :  { %v2124_v25 = vmul.f32 %v2112_v62, %v2106_v21 }
 0x169   :  { %v2132_v27 = vadd.f32 %v3679_v9, %v2124_v25 }
 0x16f   :  { %v1981_v10 = vpop.f32.mrf.mxu0 }
 0x170   :  { %v1995_v30 = vpop.f32.mrf.mxu1  ;;  %v1982_v33 = vadd.f32 %v1981_v10, %v351_v29 }
 0x172   :  { %v1996_v38 = vadd.f32 %v1995_v30, %v1982_v33 }
 0x177   :  { %v2009_v34 = vpop.f32.mrf.mxu2  ;;  %v1983_v40 = vpop.f32.mrf.mxu0 }
 0x178   :  { %v2023_v36 = vpop.f32.mrf.mxu3  ;;  %v1997_v12 = vpop.f32.mrf.mxu1  ;;  %v2010_v39 = vadd.f32 %v2009_v34, %v1996_v38  ;;  %v1984_v48 = vadd.f32 %v1983_v40, %v351_v29 }
 0x17a   :  { %v2024_v49 = vadd.f32 %v2023_v36, %v2010_v39  ;;  %v1998_v63 = vadd.f32 %v1997_v12, %v1984_v48 }
 0x17f   :  { %v2011_v44 = vpop.f32.mrf.mxu2 }
 0x180   :  { %v2025_v50 = vpop.f32.mrf.mxu3  ;;  %v2012_v59 = vadd.f32 %v2011_v44, %v1998_v63 }
 0x182   :  { %v2026_v4 = vadd.f32 %v2025_v50, %v2012_v59 }
 0x18f   :  { %v2037_v51 = vpop.f32.mrf.mxu0 }
 0x190   :  { %v2038_v54 = vadd.f32 %v2037_v51, %v2024_v49  ;;  %v2051_v55 = vpop.f32.mrf.mxu1 }
 0x192   :  { %v2052_v60 = vadd.f32 %v2051_v55, %v2038_v54 }
 0x197   :  { %v2065_v61 = vpop.f32.mrf.mxu2  ;;  %v2039_v6 = vpop.f32.mrf.mxu0 }
 0x198   :  { %v2066_v3 = vadd.f32 %v2065_v61, %v2052_v60  ;;  %v2079_v5 = vpop.f32.mrf.mxu3  ;;  %v2040_v13 = vadd.f32 %v2039_v6, %v2026_v4  ;;  %v2053_v52 = vpop.f32.mrf.mxu1 }
 0x19a   :  { %v2080_v11 = vadd.f32 %v2079_v5, %v2066_v3  ;;  %v2054_v19 = vadd.f32 %v2053_v52, %v2040_v13 }
 0x19c   :  { %vm2087_vm5 = vcmp.gt.f32.partialorder %v2080_v11, 0.0  ;;  %v2095_v16 = vmul.f32 0.2, %v2080_v11 }
 0x19e   :  { %v2103_v1 = vsel %vm2087_vm5, %v2080_v11, %v2095_v16 }
 0x19f   :  { %v2067_v20 = vpop.f32.mrf.mxu2  ;;  %v2121_v18 = vmul.f32 %v2113_v8, %v2103_v1 }
 0x1a0   :  { %v2068_v22 = vadd.f32 %v2067_v20, %v2054_v19  ;;  %v2081_v23 = vpop.f32.mrf.mxu3 }
 0x1a1   :  { %v2128_v24 = vadd.f32 %v2127_v41, %v2121_v18 }
 0x1a2   :  { %v2082_v58 = vadd.f32 %v2081_v23, %v2068_v22 }
 0x1a3   :  { %2129 = vadd.xlane.f32.xlu0 %v2128_v24 }
 0x1a4   :  { %vm2091_vm7 = vcmp.gt.f32.partialorder %v2082_v58, 0.0  ;;  %v2099_v45 = vmul.f32 0.2, %v2082_v58 }
 0x1a6   :  { %v2107_v17 = vsel %vm2091_vm7, %v2082_v58, %v2099_v45 }
 0x1a7   :  { %v2125_v26 = vmul.f32 %v2113_v8, %v2107_v17 }
 0x1a9   :  { %v2133_v10 = vadd.f32 %v2132_v27, %v2125_v26 }
 0x1ab   :  { %2134 = vadd.xlane.f32.xlu0 %v2133_v10 }
 0x216   :  { %v2130_v0 = vpop.xlane.xlu0 %2129 }
 0x217   :  { %v2138_v29 = vadd.f32 %v2137_v28, %v2130_v0 }
 0x219   :  { %v2140_v30 = vsub.f32 0.0, %v2138_v29 }
 0x21b   :  { %v2142_v31 = vmul.f32 1.442695, %v2140_v30 }
 0x21d   :  { %3472 = vpow2.f32 %v2142_v31 }
 0x21e   :  { %v2135_v32 = vpop.xlane.xlu0 %2134 }
 0x21f   :  { %v2139_v33 = vadd.f32 %v2137_v28, %v2135_v32 }
 0x221   :  { %v2141_v34 = vsub.f32 0.0, %v2139_v33 }
 0x223   :  { %v3473_v35 = vpop.eup %3472  ;;  %v2144_v36 = vmul.f32 1.442695, %v2141_v34 }
 0x224   :  { %v2146_v37 = vadd.f32 1.0, %v3473_v35 }
 0x225   :  { %3474 = vpow2.f32 %v2144_v36 }
 0x226   :  { %3476 = vrcp.f32 %v2146_v37  ;;  %v2159_v46 = vand.u32 2147483648, %v2146_v37  ;;  %v2157_v48 = vand.u32 2147483647, %v2146_v37  ;;  %vm2153_vm9 = vweird.f32 %v2146_v37 }
 0x228   :  { %v2160_v47 = vor.u32 1.1754944e-38, %v2159_v46  ;;  %vm2158_vm12 = vcmp.eq.f32.partialorder %v2157_v48, 8.507059e+37 }
 0x22b   :  { %v3475_v9 = vpop.eup %3474 }
 0x22c   :  { %v3477_v38 = vpop.eup %3476  ;;  %v2147_v40 = vadd.f32 1.0, %v3475_v9 }
 0x22d   :  { %v2149_v42 = vmul.f32 %v3477_v38, %v2146_v37  ;;  %vm2154_vm8 = vweird.f32 %v3477_v38 }
 0x22e   :  { %3478 = vrcp.f32 %v2147_v40  ;;  %vm2155_vm11 = vmor %vm2153_vm9, %vm2154_vm8  ;;  %v2173_v53 = vand.u32 2147483648, %v2147_v40  ;;  %v2171_v55 = vand.u32 2147483647, %v2147_v40  ;;  %vm2167_vm14 = vweird.f32 %v2147_v40 }
 0x22f   :  { %v2150_v12 = vsub.f32 1.0, %v2149_v42 }
 0x230   :  { %v2174_v57 = vor.u32 1.1754944e-38, %v2173_v53  ;;  %vm2172_vm0 = vcmp.eq.f32.partialorder %v2171_v55, 8.507059e+37 }
 0x231   :  { %v2151_v39 = vmul.f32 %v3477_v38, %v2150_v12 }
 0x233   :  { %v2152_v43 = vadd.f32 %v3477_v38, %v2151_v39 }
 0x234   :  { %v3479_v44 = vpop.eup %3478 }
 0x235   :  { %v2156_v49 = vsel %vm2155_vm11, %v3477_v38, %v2152_v43  ;;  %v2163_v63 = vmul.f32 %v3479_v44, %v2147_v40  ;;  %vm2168_vm13 = vweird.f32 %v3479_v44 }
 0x236   :  { %v2161_v50 = vsel %vm2158_vm12, %v2160_v47, %v2156_v49  ;;  %vm2169_vm15 = vmor %vm2167_vm14, %vm2168_vm13 }
 0x237   :  { %2177 = vst.msk [vmem:[%s3703_s5] sm:$0xff] %vm2176_vm10, %v2161_v50  ;;  %v2164_v51 = vsub.f32 1.0, %v2163_v63 }
 0x239   :  { %v2165_v54 = vmul.f32 %v3479_v44, %v2164_v51 }
 0x23b   :  { %v2166_v56 = vadd.f32 %v3479_v44, %v2165_v54 }
 0x23d   :  { %v2170_v59 = vsel %vm2169_vm15, %v3479_v44, %v2166_v56 }
 0x23e   :  { %v2175_v60 = vsel %vm2172_vm0, %v2174_v57, %v2170_v59 }
 0x23f   :  { %2178 = vst.msk [vmem:[%s3703_s5 + $0x8] sm:$0xff] %vm2176_vm10, %v2175_v60 }
 0x240   :  { %2183 = vsyncpa [#allocation4], 1 }
 0x241   :  { %2184 = vsyncpa [#allocation6], 1 }

</bundles_post_ra>
